<compile_context>
chip_gen: v7x
topology: tpu7x:2x2x1
jax: 0.10.0
libtpu: 0.0.40
codegen_flags: <defaults>
</compile_context>

<pallas_src>
import numpy as np
import jax
import jax.numpy as jnp
from jax.experimental import pallas as pl
from jax.experimental.pallas import tpu as pltpu


# ----------------------------------------------------------------------------
# Pallas kernel: CIN + DNN + final FC hot path
# ----------------------------------------------------------------------------
def xdeepfm_kernel(x0_ref,
                   wc1_ref, bc1_ref, wc2_ref, bc2_ref,
                   wd0_ref, bd0_ref, wd1_ref, bd1_ref,
                   wfc1_ref, wfc2_ref, wfc3_ref, bfc_ref,
                   logits_ref):
    x0 = x0_ref[...]                                   # (TB, Fp, D) f32
    tb, fp, d = x0.shape
    x0_b = x0.astype(jnp.bfloat16)

    def cin_layer(x_prev, w_ref, b_ref):
        # x_prev: (TB, Hin, D) f32 ; w_ref: (Hout, Fp*Hin) bf16 ; b_ref: (1, Hout, 1) f32
        h_in = x_prev.shape[1]
        h_out = w_ref.shape[0]
        # Outer product over the two field axes, flattened into one K axis.
        # (Fp and Hin are multiples of 8, so this reshape keeps the lane dim
        # and is sublane-tile aligned.)
        z = (x0[:, :, None, :] * x_prev[:, None, :, :]).reshape(tb, fp * h_in, d)
        w_b = jnp.broadcast_to(w_ref[...][None], (tb, h_out, fp * h_in))
        t = jnp.einsum('bok,bkd->bod', w_b, z.astype(jnp.bfloat16),
                       preferred_element_type=jnp.float32)
        return jnp.maximum(t + b_ref[...], 0.0)        # bias + ReLU in f32

    # ---- CIN ----
    x1 = cin_layer(x0, wc1_ref, bc1_ref)               # (TB, H1, D)
    x2 = cin_layer(x1, wc2_ref, bc2_ref)               # (TB, H2, D)
    pooled1 = jnp.sum(x1, axis=-1)                     # (TB, H1) f32
    pooled2 = jnp.sum(x2, axis=-1)                     # (TB, H2) f32

    # ---- DNN (MLP over the flattened field view, computed from x0) ----
    m0 = wd0_ref.shape[2]
    h = jnp.zeros((tb, m0), jnp.float32)
    for f in range(fp):                                # static, fp == 8
        h = h + jnp.dot(x0_b[:, f, :], wd0_ref[f],
                        preferred_element_type=jnp.float32)
    h = jnp.maximum(h + bd0_ref[...], 0.0)
    h = jnp.maximum(jnp.dot(h.astype(jnp.bfloat16), wd1_ref[...],
                            preferred_element_type=jnp.float32)
                    + bd1_ref[...], 0.0)
    # dropout: identity (eval mode)

    # ---- final FC (split along concat boundaries; no lane-axis concat) ----
    logits_ref[...] = (
        jnp.dot(pooled1, wfc1_ref[...], preferred_element_type=jnp.float32)
        + jnp.dot(pooled2, wfc2_ref[...], preferred_element_type=jnp.float32)
        + jnp.dot(h, wfc3_ref[...], preferred_element_type=jnp.float32)
        + bfc_ref[...])


# ----------------------------------------------------------------------------
# Host-side parameter preparation (done once): transpose / pad / flatten / bf16
# ----------------------------------------------------------------------------
def prepare_params(params, field_num, embed_dim, f_pad=8):
    F, D = field_num, embed_dim
    H1 = params['wc1'].shape[1]
    H2 = params['wc2'].shape[1]
    M0 = params['wd0'].shape[1]

    def pad_f(w, axis):
        pad = [(0, 0)] * w.ndim
        pad[axis] = (0, f_pad - F)
        return jnp.pad(w, pad)

    # CIN conv weights: (F, H_out, H_in)[f,o,m] -> (H_out, Fp*H_in)
    wc1 = jnp.transpose(params['wc1'], (1, 0, 2))          # (H1, F, F)
    wc1 = pad_f(pad_f(wc1, 1), 2).reshape(H1, f_pad * f_pad)
    wc2 = jnp.transpose(params['wc2'], (1, 0, 2))          # (H2, F, H1)
    wc2 = pad_f(wc2, 1).reshape(H2, f_pad * H1)
    # MLP layer-0 weight: (F*D, M0) -> (Fp, D, M0)
    wd0 = pad_f(params['wd0'].reshape(F, D, M0), 0)
    # Final FC split along the [pooled1 | pooled2 | mlp_out] concat boundaries.
    wfc = params['wfc']
    return dict(
        wc1=wc1.astype(jnp.bfloat16), bc1=params['bc1'],
        wc2=wc2.astype(jnp.bfloat16), bc2=params['bc2'],
        wd0=wd0.astype(jnp.bfloat16), bd0=params['bd0'],
        wd1=params['wd1'].astype(jnp.bfloat16), bd1=params['bd1'],
        wfc1=wfc[:H1], wfc2=wfc[H1:H1 + H2], wfc3=wfc[H1 + H2:],
        bfc=params['bfc'])


# ----------------------------------------------------------------------------
# Wrapper: batch-tiled pallas_call
# ----------------------------------------------------------------------------
def xdeepfm_pallas(inp_fields, kparams, *, tb=8, f_pad=8):
    """inp_fields: (B, F, D) f32 field embeddings. Returns logits (B, out_dim)."""
    B, F, D = inp_fields.shape
    out_dim = kparams['bfc'].shape[1]

    # pad field axis to f_pad (sublane-aligned) and batch to a multiple of tb
    pad_b = (-B) % tb
    x0 = jnp.pad(inp_fields, ((0, pad_b), (0, f_pad - F), (0, 0)))
    bp = B + pad_b

    names = ('wc1', 'bc1', 'wc2', 'bc2', 'wd0', 'bd0', 'wd1', 'bd1',
             'wfc1', 'wfc2', 'wfc3', 'bfc')
    weights = tuple(kparams[n] for n in names)

    def resident(w):    # full-array block, constant index map -> stays in VMEM
        return pl.BlockSpec(w.shape, lambda *_: (0,) * w.ndim)

    logits = pl.pallas_call(
        xdeepfm_kernel,
        out_shape=jax.ShapeDtypeStruct((bp, out_dim), jnp.float32),
        grid=(bp // tb,),
        in_specs=[pl.BlockSpec((tb, f_pad, D), lambda i: (i, 0, 0))]
                 + [resident(w) for w in weights],
        out_specs=pl.BlockSpec((tb, out_dim), lambda i: (i, 0)),
        compiler_params=pltpu.CompilerParams(
            dimension_semantics=("parallel",),      # megacore sharding on v7x
            vmem_limit_bytes=32 * 1024 * 1024),
    )(x0, *weights)
    return logits[:B]


# ----------------------------------------------------------------------------
# Pure-JAX reference (same math, f32, for a sanity check)
# ----------------------------------------------------------------------------
def xdeepfm_reference(inp_fields, params):
    B, F, D = inp_fields.shape
    x0 = inp_fields
    x1 = jnp.maximum(
        jnp.einsum('fom,bfd,bmd->bod', params['wc1'], x0, x0) + params['bc1'], 0.0)
    x2 = jnp.maximum(
        jnp.einsum('fom,bfd,bmd->bod', params['wc2'], x0, x1) + params['bc2'], 0.0)
    cin_vec = jnp.concatenate([x1.sum(-1), x2.sum(-1)], axis=-1)
    h = inp_fields.reshape(B, F * D)
    h = jnp.maximum(h @ params['wd0'] + params['bd0'], 0.0)
    h = jnp.maximum(h @ params['wd1'] + params['bd1'], 0.0)
    final_vec = jnp.concatenate([cin_vec, h], axis=-1)
    return final_vec @ params['wfc'] + params['bfc']


# ----------------------------------------------------------------------------
# get_filed_input / get_ctr_output glue (plain JAX, matching BaseModel)
# ----------------------------------------------------------------------------
def get_filed_input(tables, raw, B, L, D, attr_fnum):
    item_t, attr_t, rate_t = tables
    hist_item_emb = item_t[raw['hist_iid_seq']]                          # (B, L, D)
    hist_attr_emb = attr_t[raw['hist_aid_seq']].reshape(B, L, D * attr_fnum)
    hist_rate_emb = rate_t[raw['hist_rate_seq']]                         # (B, L, D)
    hist_emb = jnp.concatenate([hist_item_emb, hist_attr_emb, hist_rate_emb], -1)
    user_behavior = jnp.mean(hist_emb, axis=1)                           # (B, hist_fnum*D)
    iid_emb = item_t[raw['iid']]                                         # (B, D)
    attr_emb = attr_t[raw['aid']].reshape(B, D * attr_fnum)
    item_emb = jnp.concatenate([iid_emb, attr_emb], -1)                  # (B, item_fnum*D)
    inp = jnp.concatenate([item_emb, user_behavior], axis=1)
    field_num = inp.shape[1] // D
    return inp.reshape(B, field_num, D)


def get_ctr_output(logits, labels):
    probs = jnp.clip(jax.nn.sigmoid(logits), 1e-7, 1.0 - 1e-7)
    y = labels.reshape(-1).astype(jnp.float32)
    p = probs.reshape(-1)
    loss = -jnp.mean(y * jnp.log(p) + (1.0 - y) * jnp.log(1.0 - p))      # BCELoss
    return {'logits': logits, 'labels': labels, 'loss': loss}


# ----------------------------------------------------------------------------
if __name__ == "__main__":
    # ---- hyper-params (small, consistent with the module) ----
    B = 32                # batch (multiple of the 8-row batch tile -> grid of 4)
    L = 8                 # max_hist_len
    D = 16                # embed_dim
    attr_fnum = 2
    item_fnum = 1 + attr_fnum          # 3
    hist_fnum = 2 + attr_fnum          # 4
    field_num = item_fnum + hist_fnum  # 7
    item_num, attr_num, rating_num = 60, 30, 5
    cin_units = [16, 16]
    mlp_arch = [64, 32]
    output_dim = 1
    input_dim = field_num * D          # 112
    final_dim = sum(cin_units) + mlp_arch[-1]   # 64

    key = jax.random.PRNGKey(0)
    ks = jax.random.split(key, 24)

    # ---- deterministic "embedding tables" ----
    item_table = 0.1 * jax.random.normal(ks[0], (item_num + 1, D), jnp.float32)
    attr_table = 0.1 * jax.random.normal(ks[1], (attr_num + 1, D), jnp.float32)
    rate_table = 0.1 * jax.random.normal(ks[2], (rating_num + 1, D), jnp.float32)

    # ---- deterministic parameters (canonical / reference layout) ----
    H1, H2 = cin_units
    M0, M1 = mlp_arch
    params = {
        # CIN conv weights, stored as (F, H_out, H_in); biases as (1, H_out, 1)
        'wc1': 0.1 * jax.random.normal(ks[3], (field_num, H1, field_num), jnp.float32),
        'bc1': 0.1 * jax.random.normal(ks[4], (1, H1, 1), jnp.float32),
        'wc2': 0.1 * jax.random.normal(ks[5], (field_num, H2, H1), jnp.float32),
        'bc2': 0.1 * jax.random.normal(ks[6], (1, H2, 1), jnp.float32),
        # MLP weights (in, out), biases (1, out)
        'wd0': 0.1 * jax.random.normal(ks[7], (input_dim, M0), jnp.float32),
        'bd0': 0.1 * jax.random.normal(ks[8], (1, M0), jnp.float32),
        'wd1': 0.1 * jax.random.normal(ks[9], (M0, M1), jnp.float32),
        'bd1': 0.1 * jax.random.normal(ks[10], (1, M1), jnp.float32),
        # final fc
        'wfc': 0.1 * jax.random.normal(ks[11], (final_dim, output_dim), jnp.float32),
        'bfc': 0.1 * jax.random.normal(ks[12], (1, output_dim), jnp.float32),
    }

    # ---- deterministic raw inputs (the `inp` dict of process_input) ----
    raw = {
        'hist_iid_seq':  jax.random.randint(ks[13], (B, L), 0, item_num + 1),
        'hist_aid_seq':  jax.random.randint(ks[14], (B, L, attr_fnum), 0, attr_num + 1),
        'hist_rate_seq': jax.random.randint(ks[15], (B, L), 0, rating_num + 1),
        'iid':           jax.random.randint(ks[16], (B,), 0, item_num + 1),
        'aid':           jax.random.randint(ks[17], (B, attr_fnum), 0, attr_num + 1),
        'lb':            jax.random.randint(ks[18], (B,), 0, 2),
    }

    # ---- forward ----
    inp_fields = get_filed_input((item_table, attr_table, rate_table),
                                 raw, B, L, D, attr_fnum)          # (B, field_num, D)
    kparams = prepare_params(params, field_num, D, f_pad=8)        # host-side, once
    logits = xdeepfm_pallas(inp_fields, kparams, tb=8, f_pad=8)    # Pallas kernel
    outputs = get_ctr_output(logits, raw['lb'])                    # sigmoid/clamp/BCE glue
    jax.block_until_ready(outputs['logits'])
    jax.block_until_ready(outputs['loss'])

    # ---- sanity check vs pure-JAX f32 reference (kernel uses bf16 matmuls) ----
    ref = xdeepfm_reference(inp_fields, params)
    np.testing.assert_allclose(np.asarray(logits), np.asarray(ref),
                               rtol=2e-2, atol=2e-2)
    assert np.isfinite(np.asarray(outputs['loss']))

    print("KERNEL_OK")
</pallas_src>

<mosaic_0001>
module attributes {stable_mosaic.version = 11 : i64} {
  func.func @xdeepfm_kernel(%arg0: i32, %arg1: memref<8x8x16xf32, #tpu.memory_space<vmem>>, %arg2: memref<16x64xbf16, #tpu.memory_space<vmem>>, %arg3: memref<1x16x1xf32, #tpu.memory_space<vmem>>, %arg4: memref<16x128xbf16, #tpu.memory_space<vmem>>, %arg5: memref<1x16x1xf32, #tpu.memory_space<vmem>>, %arg6: memref<8x16x64xbf16, #tpu.memory_space<vmem>>, %arg7: memref<1x64xf32, #tpu.memory_space<vmem>>, %arg8: memref<64x32xbf16, #tpu.memory_space<vmem>>, %arg9: memref<1x32xf32, #tpu.memory_space<vmem>>, %arg10: memref<16x1xf32, #tpu.memory_space<vmem>>, %arg11: memref<16x1xf32, #tpu.memory_space<vmem>>, %arg12: memref<32x1xf32, #tpu.memory_space<vmem>>, %arg13: memref<1x1xf32, #tpu.memory_space<vmem>>, %arg14: memref<8x1xf32, #tpu.memory_space<vmem>>) attributes {dimension_semantics = [#tpu.dimension_semantics<parallel>], iteration_bounds = array<i64: 4>, scalar_prefetch = 0 : i64, scratch_operands = 0 : i64, tpu.core_type = #tpu.core_type<tc>, window_params = [{transform_indices = @transform_0, window_bounds = array<i64: 8, 8, 16>}, {pipeline_mode = #tpu.pipeline_mode<synchronous>, transform_indices = @transform_1, window_bounds = array<i64: 16, 64>}, {pipeline_mode = #tpu.pipeline_mode<synchronous>, transform_indices = @transform_2, window_bounds = array<i64: 1, 16, 1>}, {pipeline_mode = #tpu.pipeline_mode<synchronous>, transform_indices = @transform_3, window_bounds = array<i64: 16, 128>}, {pipeline_mode = #tpu.pipeline_mode<synchronous>, transform_indices = @transform_4, window_bounds = array<i64: 1, 16, 1>}, {pipeline_mode = #tpu.pipeline_mode<synchronous>, transform_indices = @transform_5, window_bounds = array<i64: 8, 16, 64>}, {pipeline_mode = #tpu.pipeline_mode<synchronous>, transform_indices = @transform_6, window_bounds = array<i64: 1, 64>}, {pipeline_mode = #tpu.pipeline_mode<synchronous>, transform_indices = @transform_7, window_bounds = array<i64: 64, 32>}, {pipeline_mode = #tpu.pipeline_mode<synchronous>, transform_indices = @transform_8, window_bounds = array<i64: 1, 32>}, {pipeline_mode = #tpu.pipeline_mode<synchronous>, transform_indices = @transform_9, window_bounds = array<i64: 16, 1>}, {pipeline_mode = #tpu.pipeline_mode<synchronous>, transform_indices = @transform_10, window_bounds = array<i64: 16, 1>}, {pipeline_mode = #tpu.pipeline_mode<synchronous>, transform_indices = @transform_11, window_bounds = array<i64: 32, 1>}, {pipeline_mode = #tpu.pipeline_mode<synchronous>, transform_indices = @transform_12, window_bounds = array<i64: 1, 1>}, {transform_indices = @transform_13, window_bounds = array<i64: 8, 1>}]} {
    %c0 = arith.constant 0 : index
    %c0_0 = arith.constant 0 : index
    %c0_1 = arith.constant 0 : index
    %0 = vector.load %arg1[%c0, %c0_0, %c0_1] : memref<8x8x16xf32, #tpu.memory_space<vmem>>, vector<8x8x16xf32>
    %1 = arith.truncf %0 : vector<8x8x16xf32> to vector<8x8x16xbf16>
    %2 = vector.shape_cast %0 : vector<8x8x16xf32> to vector<8x8x1x16xf32>
    %3 = vector.shape_cast %0 : vector<8x8x16xf32> to vector<8x1x8x16xf32>
    %4 = vector.broadcast %2 : vector<8x8x1x16xf32> to vector<8x8x8x16xf32>
    %5 = vector.broadcast %3 : vector<8x1x8x16xf32> to vector<8x8x8x16xf32>
    %6 = arith.mulf %4, %5 : vector<8x8x8x16xf32>
    %7 = vector.shape_cast %6 : vector<8x8x8x16xf32> to vector<8x64x16xf32>
    %c0_2 = arith.constant 0 : index
    %c0_3 = arith.constant 0 : index
    %8 = vector.load %arg2[%c0_2, %c0_3] : memref<16x64xbf16, #tpu.memory_space<vmem>>, vector<16x64xbf16>
    %9 = vector.shape_cast %8 : vector<16x64xbf16> to vector<1x16x64xbf16>
    %10 = vector.shape_cast %9 : vector<1x16x64xbf16> to vector<1x16x64xbf16>
    %11 = vector.broadcast %10 : vector<1x16x64xbf16> to vector<8x16x64xbf16>
    %12 = arith.truncf %7 : vector<8x64x16xf32> to vector<8x64x16xbf16>
    "tpu.trace_start"() <{level = 10 : i32, message = "bok,bkd->bod"}> : () -> ()
    %cst = arith.constant dense<0.000000e+00> : vector<8x16x16xf32>
    %13 = tpu.matmul %11, %12, %cst {dimension_numbers = #tpu.dot_dimension_numbers<[2], [1], [1], [2], [0, 0, 0, 1, 1, 2], [0], [0]>} : vector<8x16x64xbf16>, vector<8x64x16xbf16>, vector<8x16x16xf32> -> vector<8x16x16xf32>
    "tpu.trace_stop"() : () -> ()
    %c0_4 = arith.constant 0 : index
    %c0_5 = arith.constant 0 : index
    %c0_6 = arith.constant 0 : index
    %14 = vector.load %arg3[%c0_4, %c0_5, %c0_6] : memref<1x16x1xf32, #tpu.memory_space<vmem>>, vector<1x16x1xf32>
    %15 = vector.broadcast %14 : vector<1x16x1xf32> to vector<8x16x16xf32>
    %16 = arith.addf %13, %15 : vector<8x16x16xf32>
    %cst_7 = arith.constant 0.000000e+00 : f32
    %17 = vector.broadcast %cst_7 : f32 to vector<8x16x16xf32>
    %18 = arith.maximumf %16, %17 : vector<8x16x16xf32>
    %19 = vector.shape_cast %0 : vector<8x8x16xf32> to vector<8x8x1x16xf32>
    %20 = vector.shape_cast %18 : vector<8x16x16xf32> to vector<8x1x16x16xf32>
    %21 = vector.broadcast %19 : vector<8x8x1x16xf32> to vector<8x8x16x16xf32>
    %22 = vector.broadcast %20 : vector<8x1x16x16xf32> to vector<8x8x16x16xf32>
    %23 = arith.mulf %21, %22 : vector<8x8x16x16xf32>
    %24 = vector.shape_cast %23 : vector<8x8x16x16xf32> to vector<8x128x16xf32>
    %c0_8 = arith.constant 0 : index
    %c0_9 = arith.constant 0 : index
    %25 = vector.load %arg4[%c0_8, %c0_9] : memref<16x128xbf16, #tpu.memory_space<vmem>>, vector<16x128xbf16>
    %26 = vector.shape_cast %25 : vector<16x128xbf16> to vector<1x16x128xbf16>
    %27 = vector.shape_cast %26 : vector<1x16x128xbf16> to vector<1x16x128xbf16>
    %28 = vector.broadcast %27 : vector<1x16x128xbf16> to vector<8x16x128xbf16>
    %29 = arith.truncf %24 : vector<8x128x16xf32> to vector<8x128x16xbf16>
    "tpu.trace_start"() <{level = 10 : i32, message = "bok,bkd->bod"}> : () -> ()
    %cst_10 = arith.constant dense<0.000000e+00> : vector<8x16x16xf32>
    %30 = tpu.matmul %28, %29, %cst_10 {dimension_numbers = #tpu.dot_dimension_numbers<[2], [1], [1], [2], [0, 0, 0, 1, 1, 2], [0], [0]>} : vector<8x16x128xbf16>, vector<8x128x16xbf16>, vector<8x16x16xf32> -> vector<8x16x16xf32>
    "tpu.trace_stop"() : () -> ()
    %c0_11 = arith.constant 0 : index
    %c0_12 = arith.constant 0 : index
    %c0_13 = arith.constant 0 : index
    %31 = vector.load %arg5[%c0_11, %c0_12, %c0_13] : memref<1x16x1xf32, #tpu.memory_space<vmem>>, vector<1x16x1xf32>
    %32 = vector.broadcast %31 : vector<1x16x1xf32> to vector<8x16x16xf32>
    %33 = arith.addf %30, %32 : vector<8x16x16xf32>
    %cst_14 = arith.constant 0.000000e+00 : f32
    %34 = vector.broadcast %cst_14 : f32 to vector<8x16x16xf32>
    %35 = arith.maximumf %33, %34 : vector<8x16x16xf32>
    %cst_15 = arith.constant dense<0.000000e+00> : vector<8x16xf32>
    %36 = vector.multi_reduction <add>, %18, %cst_15 [2] : vector<8x16x16xf32> to vector<8x16xf32>
    %cst_16 = arith.constant dense<0.000000e+00> : vector<8x16xf32>
    %37 = vector.multi_reduction <add>, %35, %cst_16 [2] : vector<8x16x16xf32> to vector<8x16xf32>
    %cst_17 = arith.constant 0.000000e+00 : f32
    %38 = vector.broadcast %cst_17 : f32 to vector<8x64xf32>
    %39 = vector.extract_strided_slice %1 {offsets = [0, 0, 0], sizes = [8, 1, 16], strides = [1, 1, 1]} : vector<8x8x16xbf16> to vector<8x1x16xbf16>
    %40 = vector.shape_cast %39 : vector<8x1x16xbf16> to vector<8x16xbf16>
    %c0_18 = arith.constant 0 : index
    %c0_19 = arith.constant 0 : index
    %c0_20 = arith.constant 0 : index
    %41 = vector.load %arg6[%c0_18, %c0_19, %c0_20] : memref<8x16x64xbf16, #tpu.memory_space<vmem>>, vector<1x16x64xbf16>
    %42 = vector.shape_cast %41 : vector<1x16x64xbf16> to vector<16x64xbf16>
    %cst_21 = arith.constant dense<0.000000e+00> : vector<8x64xf32>
    %43 = tpu.matmul %40, %42, %cst_21 {dimension_numbers = #tpu.dot_dimension_numbers<[1], [0], [0], [1], [0, 0, 1, 1], [], []>} : vector<8x16xbf16>, vector<16x64xbf16>, vector<8x64xf32> -> vector<8x64xf32>
    %44 = arith.addf %38, %43 : vector<8x64xf32>
    %45 = vector.extract_strided_slice %1 {offsets = [0, 1, 0], sizes = [8, 1, 16], strides = [1, 1, 1]} : vector<8x8x16xbf16> to vector<8x1x16xbf16>
    %46 = vector.shape_cast %45 : vector<8x1x16xbf16> to vector<8x16xbf16>
    %c1 = arith.constant 1 : index
    %c0_22 = arith.constant 0 : index
    %c0_23 = arith.constant 0 : index
    %47 = vector.load %arg6[%c1, %c0_22, %c0_23] : memref<8x16x64xbf16, #tpu.memory_space<vmem>>, vector<1x16x64xbf16>
    %48 = vector.shape_cast %47 : vector<1x16x64xbf16> to vector<16x64xbf16>
    %cst_24 = arith.constant dense<0.000000e+00> : vector<8x64xf32>
    %49 = tpu.matmul %46, %48, %cst_24 {dimension_numbers = #tpu.dot_dimension_numbers<[1], [0], [0], [1], [0, 0, 1, 1], [], []>} : vector<8x16xbf16>, vector<16x64xbf16>, vector<8x64xf32> -> vector<8x64xf32>
    %50 = arith.addf %44, %49 : vector<8x64xf32>
    %51 = vector.extract_strided_slice %1 {offsets = [0, 2, 0], sizes = [8, 1, 16], strides = [1, 1, 1]} : vector<8x8x16xbf16> to vector<8x1x16xbf16>
    %52 = vector.shape_cast %51 : vector<8x1x16xbf16> to vector<8x16xbf16>
    %c2 = arith.constant 2 : index
    %c0_25 = arith.constant 0 : index
    %c0_26 = arith.constant 0 : index
    %53 = vector.load %arg6[%c2, %c0_25, %c0_26] : memref<8x16x64xbf16, #tpu.memory_space<vmem>>, vector<1x16x64xbf16>
    %54 = vector.shape_cast %53 : vector<1x16x64xbf16> to vector<16x64xbf16>
    %cst_27 = arith.constant dense<0.000000e+00> : vector<8x64xf32>
    %55 = tpu.matmul %52, %54, %cst_27 {dimension_numbers = #tpu.dot_dimension_numbers<[1], [0], [0], [1], [0, 0, 1, 1], [], []>} : vector<8x16xbf16>, vector<16x64xbf16>, vector<8x64xf32> -> vector<8x64xf32>
    %56 = arith.addf %50, %55 : vector<8x64xf32>
    %57 = vector.extract_strided_slice %1 {offsets = [0, 3, 0], sizes = [8, 1, 16], strides = [1, 1, 1]} : vector<8x8x16xbf16> to vector<8x1x16xbf16>
    %58 = vector.shape_cast %57 : vector<8x1x16xbf16> to vector<8x16xbf16>
    %c3 = arith.constant 3 : index
    %c0_28 = arith.constant 0 : index
    %c0_29 = arith.constant 0 : index
    %59 = vector.load %arg6[%c3, %c0_28, %c0_29] : memref<8x16x64xbf16, #tpu.memory_space<vmem>>, vector<1x16x64xbf16>
    %60 = vector.shape_cast %59 : vector<1x16x64xbf16> to vector<16x64xbf16>
    %cst_30 = arith.constant dense<0.000000e+00> : vector<8x64xf32>
    %61 = tpu.matmul %58, %60, %cst_30 {dimension_numbers = #tpu.dot_dimension_numbers<[1], [0], [0], [1], [0, 0, 1, 1], [], []>} : vector<8x16xbf16>, vector<16x64xbf16>, vector<8x64xf32> -> vector<8x64xf32>
    %62 = arith.addf %56, %61 : vector<8x64xf32>
    %63 = vector.extract_strided_slice %1 {offsets = [0, 4, 0], sizes = [8, 1, 16], strides = [1, 1, 1]} : vector<8x8x16xbf16> to vector<8x1x16xbf16>
    %64 = vector.shape_cast %63 : vector<8x1x16xbf16> to vector<8x16xbf16>
    %c4 = arith.constant 4 : index
    %c0_31 = arith.constant 0 : index
    %c0_32 = arith.constant 0 : index
    %65 = vector.load %arg6[%c4, %c0_31, %c0_32] : memref<8x16x64xbf16, #tpu.memory_space<vmem>>, vector<1x16x64xbf16>
    %66 = vector.shape_cast %65 : vector<1x16x64xbf16> to vector<16x64xbf16>
    %cst_33 = arith.constant dense<0.000000e+00> : vector<8x64xf32>
    %67 = tpu.matmul %64, %66, %cst_33 {dimension_numbers = #tpu.dot_dimension_numbers<[1], [0], [0], [1], [0, 0, 1, 1], [], []>} : vector<8x16xbf16>, vector<16x64xbf16>, vector<8x64xf32> -> vector<8x64xf32>
    %68 = arith.addf %62, %67 : vector<8x64xf32>
    %69 = vector.extract_strided_slice %1 {offsets = [0, 5, 0], sizes = [8, 1, 16], strides = [1, 1, 1]} : vector<8x8x16xbf16> to vector<8x1x16xbf16>
    %70 = vector.shape_cast %69 : vector<8x1x16xbf16> to vector<8x16xbf16>
    %c5 = arith.constant 5 : index
    %c0_34 = arith.constant 0 : index
    %c0_35 = arith.constant 0 : index
    %71 = vector.load %arg6[%c5, %c0_34, %c0_35] : memref<8x16x64xbf16, #tpu.memory_space<vmem>>, vector<1x16x64xbf16>
    %72 = vector.shape_cast %71 : vector<1x16x64xbf16> to vector<16x64xbf16>
    %cst_36 = arith.constant dense<0.000000e+00> : vector<8x64xf32>
    %73 = tpu.matmul %70, %72, %cst_36 {dimension_numbers = #tpu.dot_dimension_numbers<[1], [0], [0], [1], [0, 0, 1, 1], [], []>} : vector<8x16xbf16>, vector<16x64xbf16>, vector<8x64xf32> -> vector<8x64xf32>
    %74 = arith.addf %68, %73 : vector<8x64xf32>
    %75 = vector.extract_strided_slice %1 {offsets = [0, 6, 0], sizes = [8, 1, 16], strides = [1, 1, 1]} : vector<8x8x16xbf16> to vector<8x1x16xbf16>
    %76 = vector.shape_cast %75 : vector<8x1x16xbf16> to vector<8x16xbf16>
    %c6 = arith.constant 6 : index
    %c0_37 = arith.constant 0 : index
    %c0_38 = arith.constant 0 : index
    %77 = vector.load %arg6[%c6, %c0_37, %c0_38] : memref<8x16x64xbf16, #tpu.memory_space<vmem>>, vector<1x16x64xbf16>
    %78 = vector.shape_cast %77 : vector<1x16x64xbf16> to vector<16x64xbf16>
    %cst_39 = arith.constant dense<0.000000e+00> : vector<8x64xf32>
    %79 = tpu.matmul %76, %78, %cst_39 {dimension_numbers = #tpu.dot_dimension_numbers<[1], [0], [0], [1], [0, 0, 1, 1], [], []>} : vector<8x16xbf16>, vector<16x64xbf16>, vector<8x64xf32> -> vector<8x64xf32>
    %80 = arith.addf %74, %79 : vector<8x64xf32>
    %81 = vector.extract_strided_slice %1 {offsets = [0, 7, 0], sizes = [8, 1, 16], strides = [1, 1, 1]} : vector<8x8x16xbf16> to vector<8x1x16xbf16>
    %82 = vector.shape_cast %81 : vector<8x1x16xbf16> to vector<8x16xbf16>
    %c7 = arith.constant 7 : index
    %c0_40 = arith.constant 0 : index
    %c0_41 = arith.constant 0 : index
    %83 = vector.load %arg6[%c7, %c0_40, %c0_41] : memref<8x16x64xbf16, #tpu.memory_space<vmem>>, vector<1x16x64xbf16>
    %84 = vector.shape_cast %83 : vector<1x16x64xbf16> to vector<16x64xbf16>
    %cst_42 = arith.constant dense<0.000000e+00> : vector<8x64xf32>
    %85 = tpu.matmul %82, %84, %cst_42 {dimension_numbers = #tpu.dot_dimension_numbers<[1], [0], [0], [1], [0, 0, 1, 1], [], []>} : vector<8x16xbf16>, vector<16x64xbf16>, vector<8x64xf32> -> vector<8x64xf32>
    %86 = arith.addf %80, %85 : vector<8x64xf32>
    %c0_43 = arith.constant 0 : index
    %c0_44 = arith.constant 0 : index
    %87 = vector.load %arg7[%c0_43, %c0_44] : memref<1x64xf32, #tpu.memory_space<vmem>>, vector<1x64xf32>
    %88 = vector.broadcast %87 : vector<1x64xf32> to vector<8x64xf32>
    %89 = arith.addf %86, %88 : vector<8x64xf32>
    %cst_45 = arith.constant 0.000000e+00 : f32
    %90 = vector.broadcast %cst_45 : f32 to vector<8x64xf32>
    %91 = arith.maximumf %89, %90 : vector<8x64xf32>
    %92 = arith.truncf %91 : vector<8x64xf32> to vector<8x64xbf16>
    %c0_46 = arith.constant 0 : index
    %c0_47 = arith.constant 0 : index
    %93 = vector.load %arg8[%c0_46, %c0_47] : memref<64x32xbf16, #tpu.memory_space<vmem>>, vector<64x32xbf16>
    %cst_48 = arith.constant dense<0.000000e+00> : vector<8x32xf32>
    %94 = tpu.matmul %92, %93, %cst_48 {dimension_numbers = #tpu.dot_dimension_numbers<[1], [0], [0], [1], [0, 0, 1, 1], [], []>} : vector<8x64xbf16>, vector<64x32xbf16>, vector<8x32xf32> -> vector<8x32xf32>
    %c0_49 = arith.constant 0 : index
    %c0_50 = arith.constant 0 : index
    %95 = vector.load %arg9[%c0_49, %c0_50] : memref<1x32xf32, #tpu.memory_space<vmem>>, vector<1x32xf32>
    %96 = vector.broadcast %95 : vector<1x32xf32> to vector<8x32xf32>
    %97 = arith.addf %94, %96 : vector<8x32xf32>
    %cst_51 = arith.constant 0.000000e+00 : f32
    %98 = vector.broadcast %cst_51 : f32 to vector<8x32xf32>
    %99 = arith.maximumf %97, %98 : vector<8x32xf32>
    %c0_52 = arith.constant 0 : index
    %c0_53 = arith.constant 0 : index
    %100 = vector.load %arg10[%c0_52, %c0_53] : memref<16x1xf32, #tpu.memory_space<vmem>>, vector<16x1xf32>
    %cst_54 = arith.constant dense<0.000000e+00> : vector<8x1xf32>
    %101 = tpu.matmul %36, %100, %cst_54 {dimension_numbers = #tpu.dot_dimension_numbers<[1], [0], [0], [1], [0, 0, 1, 1], [], []>} : vector<8x16xf32>, vector<16x1xf32>, vector<8x1xf32> -> vector<8x1xf32>
    %c0_55 = arith.constant 0 : index
    %c0_56 = arith.constant 0 : index
    %102 = vector.load %arg11[%c0_55, %c0_56] : memref<16x1xf32, #tpu.memory_space<vmem>>, vector<16x1xf32>
    %cst_57 = arith.constant dense<0.000000e+00> : vector<8x1xf32>
    %103 = tpu.matmul %37, %102, %cst_57 {dimension_numbers = #tpu.dot_dimension_numbers<[1], [0], [0], [1], [0, 0, 1, 1], [], []>} : vector<8x16xf32>, vector<16x1xf32>, vector<8x1xf32> -> vector<8x1xf32>
    %104 = arith.addf %101, %103 : vector<8x1xf32>
    %c0_58 = arith.constant 0 : index
    %c0_59 = arith.constant 0 : index
    %105 = vector.load %arg12[%c0_58, %c0_59] : memref<32x1xf32, #tpu.memory_space<vmem>>, vector<32x1xf32>
    %cst_60 = arith.constant dense<0.000000e+00> : vector<8x1xf32>
    %106 = tpu.matmul %99, %105, %cst_60 {dimension_numbers = #tpu.dot_dimension_numbers<[1], [0], [0], [1], [0, 0, 1, 1], [], []>} : vector<8x32xf32>, vector<32x1xf32>, vector<8x1xf32> -> vector<8x1xf32>
    %107 = arith.addf %104, %106 : vector<8x1xf32>
    %c0_61 = arith.constant 0 : index
    %c0_62 = arith.constant 0 : index
    %108 = vector.load %arg13[%c0_61, %c0_62] : memref<1x1xf32, #tpu.memory_space<vmem>>, vector<1x1xf32>
    %109 = vector.broadcast %108 : vector<1x1xf32> to vector<8x1xf32>
    %110 = arith.addf %107, %109 : vector<8x1xf32>
    %c0_63 = arith.constant 0 : index
    %c0_64 = arith.constant 0 : index
    %111 = vector.load %arg14[%c0_63, %c0_64] : memref<8x1xf32, #tpu.memory_space<vmem>>, vector<8x1xf32>
    tpu.vector_store %arg14[%c0_63, %c0_64], %110 {strides = array<i32>} : memref<8x1xf32, #tpu.memory_space<vmem>>, vector<8x1xf32>,
    return
  }
  func.func @transform_0(%arg0: i32) -> (i32, i32, i32) {
    %c0_i32 = arith.constant 0 : i32
    %c0_i32_0 = arith.constant 0 : i32
    %c0_i32_1 = arith.constant 0 : i32
    return %arg0, %c0_i32, %c0_i32_0 : i32, i32, i32
  }
  func.func @transform_1(%arg0: i32) -> (i32, i32) {
    %c0_i32 = arith.constant 0 : i32
    %c0_i32_0 = arith.constant 0 : i32
    %c0_i32_1 = arith.constant 0 : i32
    return %c0_i32, %c0_i32_0 : i32, i32
  }
  func.func @transform_2(%arg0: i32) -> (i32, i32, i32) {
    %c0_i32 = arith.constant 0 : i32
    %c0_i32_0 = arith.constant 0 : i32
    %c0_i32_1 = arith.constant 0 : i32
    %c0_i32_2 = arith.constant 0 : i32
    return %c0_i32, %c0_i32_0, %c0_i32_1 : i32, i32, i32
  }
  func.func @transform_3(%arg0: i32) -> (i32, i32) {
    %c0_i32 = arith.constant 0 : i32
    %c0_i32_0 = arith.constant 0 : i32
    %c0_i32_1 = arith.constant 0 : i32
    return %c0_i32, %c0_i32_0 : i32, i32
  }
  func.func @transform_4(%arg0: i32) -> (i32, i32, i32) {
    %c0_i32 = arith.constant 0 : i32
    %c0_i32_0 = arith.constant 0 : i32
    %c0_i32_1 = arith.constant 0 : i32
    %c0_i32_2 = arith.constant 0 : i32
    return %c0_i32, %c0_i32_0, %c0_i32_1 : i32, i32, i32
  }
  func.func @transform_5(%arg0: i32) -> (i32, i32, i32) {
    %c0_i32 = arith.constant 0 : i32
    %c0_i32_0 = arith.constant 0 : i32
    %c0_i32_1 = arith.constant 0 : i32
    %c0_i32_2 = arith.constant 0 : i32
    return %c0_i32, %c0_i32_0, %c0_i32_1 : i32, i32, i32
  }
  func.func @transform_6(%arg0: i32) -> (i32, i32) {
    %c0_i32 = arith.constant 0 : i32
    %c0_i32_0 = arith.constant 0 : i32
    %c0_i32_1 = arith.constant 0 : i32
    return %c0_i32, %c0_i32_0 : i32, i32
  }
  func.func @transform_7(%arg0: i32) -> (i32, i32) {
    %c0_i32 = arith.constant 0 : i32
    %c0_i32_0 = arith.constant 0 : i32
    %c0_i32_1 = arith.constant 0 : i32
    return %c0_i32, %c0_i32_0 : i32, i32
  }
  func.func @transform_8(%arg0: i32) -> (i32, i32) {
    %c0_i32 = arith.constant 0 : i32
    %c0_i32_0 = arith.constant 0 : i32
    %c0_i32_1 = arith.constant 0 : i32
    return %c0_i32, %c0_i32_0 : i32, i32
  }
  func.func @transform_9(%arg0: i32) -> (i32, i32) {
    %c0_i32 = arith.constant 0 : i32
    %c0_i32_0 = arith.constant 0 : i32
    %c0_i32_1 = arith.constant 0 : i32
    return %c0_i32, %c0_i32_0 : i32, i32
  }
  func.func @transform_10(%arg0: i32) -> (i32, i32) {
    %c0_i32 = arith.constant 0 : i32
    %c0_i32_0 = arith.constant 0 : i32
    %c0_i32_1 = arith.constant 0 : i32
    return %c0_i32, %c0_i32_0 : i32, i32
  }
  func.func @transform_11(%arg0: i32) -> (i32, i32) {
    %c0_i32 = arith.constant 0 : i32
    %c0_i32_0 = arith.constant 0 : i32
    %c0_i32_1 = arith.constant 0 : i32
    return %c0_i32, %c0_i32_0 : i32, i32
  }
  func.func @transform_12(%arg0: i32) -> (i32, i32) {
    %c0_i32 = arith.constant 0 : i32
    %c0_i32_0 = arith.constant 0 : i32
    %c0_i32_1 = arith.constant 0 : i32
    return %c0_i32, %c0_i32_0 : i32, i32
  }
  func.func @transform_13(%arg0: i32) -> (i32, i32) {
    %c0_i32 = arith.constant 0 : i32
    %c0_i32_0 = arith.constant 0 : i32
    return %arg0, %c0_i32 : i32, i32
  }
}

</mosaic_0001>

<bundles_post_ra>
// kernel: tpu_custom_call.1
= control target key start
LH: loop header
LB: loop body
LE: loop exit
PB: predicated region body
PF: predicated region fallthrough
CT: control target
= control target key end

     0   :  { %s4126_s27 = smov 0   ;;  %s6005_s0 = inlined_call_operand.vmem [shape: f32[32,8,16], index: 0, kind: input, shape index: {}]   ;;  %s6006_s1 = inlined_call_operand.vmem [shape: bf16[16,64], index: 1, kind: input, shape index: {}]   ;;  %s6007_s2 = inlined_call_operand.vmem [shape: f32[1,16,1], index: 2, kind: input, shape index: {}]   ;;  %s6008_s3 = inlined_call_operand.vmem [shape: bf16[16,128], index: 3, kind: input, shape index: {}]   ;;  %s6009_s4 = inlined_call_operand.vmem [shape: f32[1,16,1], index: 4, kind: input, shape index: {}]   ;;  %s6010_s5 = inlined_call_operand.vmem [shape: bf16[8,16,64], index: 5, kind: input, shape index: {}]   ;;  %s6011_s6 = inlined_call_operand.vmem [shape: f32[1,64], index: 6, kind: input, shape index: {}]   ;;  %s6012_s7 = inlined_call_operand.vmem [shape: bf16[64,32], index: 7, kind: input, shape index: {}]   ;;  %s6013_s8 = inlined_call_operand.vmem [shape: f32[1,32], index: 8, kind: input, shape index: {}]   ;;  %s6014_s9 = inlined_call_operand.vmem [shape: f32[16,1], index: 9, kind: input, shape index: {}]   ;;  %s6015_s10 = inlined_call_operand.vmem [shape: f32[16,1], index: 10, kind: input, shape index: {}]   ;;  %s6016_s11 = inlined_call_operand.vmem [shape: f32[32,1], index: 11, kind: input, shape index: {}]   ;;  %s6017_s12 = inlined_call_operand.<no memory space> [shape: f32[1,1], index: 12, kind: input, shape index: {}]   ;;  %s6018_s13 = inlined_call_operand.vmem [shape: f32[32,1], index: 13, kind: output, shape index: {}]  }
   0x1   :  { %v18_v0 = vstv %s6017_s12 }
   0x2   :  { %19 = vst [vmem:[#allocation2] sm:$0x1] %v18_v0 }
   0x3 LB: > { %s4132_s28 = sadd.s32 4294967295, %s4046_s27   ;;  %p3441_p0 = scmp.ge.s32.totalorder %s4046_s27, 1  ;;  %s4046_s27 = sphi %s4126_s27, %s25_s27  }
   0x4   : > { %p390_p1 = scmp.lt.s32.totalorder %s4046_s27, 5 }
   0x6   : > { %p391_p2 = pnand %p3441_p0, %p390_p1 }
   0x8   : > { %394 = sbr.rel (%p391_p2) target bundleno = 1090 (0x442), region = 72 }
   0xf   : > { %s3442_s29 = sshll.u32 %s4132_s28, 3  ;;  %v6019_v1 = vlaneseq  ;;  %v6052_v2 = vmov 0.0   ;;  %v4049_v3 = vmov 1966171168   ;;  %vm4050_vm0 = vmmov 0   ;;  %v1278_v6 = vld [vmem:[%s6007_s2] sm:$0xff] }
  0x10   : > { %3642 = vmatprep.subr.bf16.mxu0 %v6052_v2  ;;  %3654 = vmatprep.subr.bf16.mxu1 %v6052_v2  ;;  %p434_p3 = scmp.lt.s32.totalorder %s3442_s29, 31  ;;  %v470_v4 = vunpack.c.l.s4 %v4049_v3  ;;  %v1837_v7 = vld [vmem:[%s6009_s4] sm:$0xff]  ;;  %v4051_v9 = vmov 0   ;;  %v1279_v10 = vld [vmem:[%s6007_s2 + $0x8] sm:$0xff]  ;;  %vm1295_vm1 = vcmask 523264   ;;  %vm2199_vm2 = vcmask 130048  }
  0x11   : > { %v4140_v5 = vshrl.u32 %v6019_v1, 7  ;;  %3650 = vmatprep.mubr.msk.bf16.mxu0 %vm4050_vm0, %v6052_v2  ;;  %3662 = vmatprep.mubr.msk.bf16.mxu1 %vm4050_vm0, %v6052_v2  ;;  %v1838_v12 = vld [vmem:[%s6009_s4 + $0x8] sm:$0xff]  ;;  %vm2318_vm3 = vcmask 1041409   ;;  %vm2321_vm4 = vcmask 1042434   ;;  %vm2324_vm5 = vcmask 1043459   ;;  %p439_p4 = scmp.lt.s32.totalorder %s4132_s28, 3 }
  0x12   : > { %s6223_s29 = smov (!%p434_p3, %s3442_s29), 31  ;;  %v471_v8 = vunpack.c.0.s8 %v470_v4  ;;  %4008 = vset.pattern.permute.xlu0 %v4051_v9  ;;  %4009 = vset.pattern.permute.xlu1 %v4051_v9  ;;  %vm2327_vm6 = vcmask 1044484   ;;  %vm2330_vm7 = vcmask 1045509   ;;  %vm2333_vm8 = vcmask 1046534  }
  0x13   : > { %6088 = vst [vmem:[#allocation3_spill] sm:$0xff] %v4140_v5  ;;  %1282 = vperm.xlu0 %4008, %v1278_v6   ;;  %1841 = vperm.xlu1 %4009, %v1837_v7   ;;  %s3443_s18 = sshll.u32 %s6223_s29, 3  ;;  %v4170_v14 = vsub.s32 0, %v4140_v5  ;;  %vm2336_vm9 = vcmask 1047559   ;;  %vm2984_vm10 = vcmask 130112   ;;  %vm3299_vm11 = vcmask 261120  }
  0x14   : > { %v4156_v11 = vsub.s32 %v471_v8, %v4140_v5  ;;  %s4164_s23 = scalar_lea.vmem %s6005_s0, %s3443_s18  ;;  %s6225_s28 = smov (!%p439_p4, %s4132_s28), 3  ;;  %vm3382_vm12 = vcmask 7168  }
  0x15   : > { %v4167_v13 = vld [vmem:[%s4164_s23] sm:$0xff]  ;;  %v4173_v15 = vld [vmem:[%s4164_s23 + $0x8] sm:$0xff]  ;;  %v4176_v16 = vld [vmem:[%s4164_s23 + $0x10] sm:$0xff]  ;;  %s3444_s24 = sshll.u32 %s6225_s28, 3 }
  0x16   : > { %v475_v17 = vrot.slane %v4167_v13, %v4156_v11  ;;  %v524_v18 = vrot.slane %v4173_v15, %v4156_v11  ;;  %v468_v19 = vcombine.high %v4167_v13, %v4167_v13  ;;  %v517_v20 = vcombine.high %v4173_v15, %v4173_v15  ;;  %v4187_v21 = vld [vmem:[%s4164_s23 + $0x18] sm:$0xff]  ;;  %v4505_v5 = vld [vmem:[%s4164_s23 + $0x30] sm:$0xff]  ;;  %s442_s29 = scalar_lea.vmem %s6018_s13, %s3444_s24 }
  0x17   : > { %1287 = vperm.xlu0 %4008, %v1279_v10   ;;  %v573_v22 = vrot.slane %v4176_v16, %v4156_v11  ;;  %v4193_v23 = vrot.slane %v4187_v21, %v4156_v11  ;;  %v566_v24 = vcombine.high %v4176_v16, %v4176_v16  ;;  %v615_v25 = vcombine.high %v4187_v21, %v4187_v21 }
  0x18   : > { %1846 = vperm.xlu1 %4009, %v1838_v12   ;;  %v483_v26 = vcombine.high %v475_v17, %v475_v17  ;;  %v491_v27 = vrot.slane %v475_v17, %v4156_v11  ;;  %v532_v28 = vcombine.high %v524_v18, %v524_v18  ;;  %v540_v29 = vrot.slane %v524_v18, %v4156_v11 }
  0x19   : > { %v482_v30 = vrot.slane %v468_v19, %v4156_v11  ;;  %v531_v31 = vrot.slane %v517_v20, %v4156_v11  ;;  %v581_v32 = vcombine.high %v573_v22, %v573_v22  ;;  %v4204_v33 = vrot.slane %v573_v22, %v4156_v11 }
  0x1a   : > { %v505_v34 = vrot.slane %v483_v26, %v4156_v11  ;;  %v513_v35 = vcombine.high %v491_v27, %v491_v27  ;;  %v4208_v36 = vrot.slane %v491_v27, %v4170_v14  ;;  %v554_v37 = vrot.slane %v532_v28, %v4156_v11 }
  0x1b   : > { %v562_v38 = vcombine.high %v540_v29, %v540_v29  ;;  %v4212_v39 = vrot.slane %v540_v29, %v4170_v14  ;;  %v484_v40 = vcombine.high %v482_v30, %v482_v30  ;;  %v498_v41 = vrot.slane %v482_v30, %v4156_v11 }
  0x1c   : > { %v515_v42 = vcombine.high %v505_v34, %v505_v34  ;;  %v4216_v43 = vrot.slane %v505_v34, %v4170_v14  ;;  %v1180_v44 = vmul.f32 %v4208_v36, %v4167_v13  ;;  %v564_v45 = vcombine.high %v554_v37, %v554_v37 }
  0x1d   : > { %v4221_v46 = vrot.slane %v554_v37, %v4170_v14  ;;  %v1188_v47 = vmul.f32 %v4212_v39, %v4173_v15  ;;  %v4226_v48 = vrot.slane %v513_v35, %v4170_v14  ;;  %v4229_v49 = vrot.slane %v562_v38, %v4170_v14 }
  0x1e   : > { %v1181_v50 = vmul.f32 %v4216_v43, %v4167_v13  ;;  %v4234_v51 = vrot.slane %v515_v42, %v4170_v14  ;;  %v4237_v52 = vrot.slane %v564_v45, %v4170_v14  ;;  %v512_v53 = vrot.slane %v484_v40, %v4156_v11 }
  0x1f   : > { %v1189_v54 = vmul.f32 %v4221_v46, %v4173_v15  ;;  %v1182_v55 = vmul.f32 %v4226_v48, %v4167_v13  ;;  %v1190_v56 = vmul.f32 %v4229_v49, %v4173_v15  ;;  %v4247_v57 = vrot.slane %v498_v41, %v4170_v14 }
  0x20   : > { %v1246_v58 = vpack.c.bf16 %v1181_v50, %v1180_v44  ;;  %v1183_v59 = vmul.f32 %v4234_v51, %v4167_v13  ;;  %v1191_v60 = vmul.f32 %v4237_v52, %v4173_v15  ;;  %v4254_v61 = vrot.slane %v512_v53, %v4170_v14 }
  0x21   : > { %v1250_v62 = vpack.c.bf16 %v1189_v54, %v1188_v47  ;;  %v1184_v63 = vmul.f32 %v4247_v57, %v4167_v13  ;;  %v533_v0 = vcombine.high %v531_v31, %v531_v31  ;;  %v547_v3 = vrot.slane %v531_v31, %v4156_v11 }
  0x22   : > { %3643 = vmatpush3.bf16.msra.mxu0 %v1246_v58  ;;  %v1247_v4 = vpack.c.bf16 %v1183_v59, %v1182_v55  ;;  %v1251_v6 = vpack.c.bf16 %v1191_v60, %v1190_v56  ;;  %v1185_v7 = vmul.f32 %v4254_v61, %v4167_v13  ;;  %v514_v8 = vcombine.high %v498_v41, %v498_v41 }
  0x23   : > { %3655 = vmatpush3.bf16.msra.mxu1 %v1250_v62  ;;  %3644 = vmatprep.subr.bf16.mxu0 %v6052_v2  ;;  %v561_v9 = vrot.slane %v533_v0, %v4156_v11  ;;  %v4264_v10 = vrot.slane %v547_v3, %v4170_v14  ;;  %v516_v12 = vcombine.high %v512_v53, %v512_v53  ;;  %v4332_v62 = vld [vmem:[%s6006_s1] sm:$0xff]  }
  0x24   : > { %3656 = vmatprep.subr.bf16.mxu1 %v6052_v2  ;;  %v1248_v17 = vpack.c.bf16 %v1185_v7, %v1184_v63  ;;  %v4268_v18 = vrot.slane %v514_v8, %v4170_v14  ;;  %v563_v19 = vcombine.high %v547_v3, %v547_v3  ;;  %v603_v20 = vrot.slane %v581_v32, %v4156_v11 }
  0x25   : > { %v4272_v22 = vrot.slane %v561_v9, %v4170_v14  ;;  %v1192_v26 = vmul.f32 %v4264_v10, %v4173_v15  ;;  %v4277_v27 = vrot.slane %v516_v12, %v4170_v14  ;;  %v565_v28 = vcombine.high %v561_v9, %v561_v9 }
  0x26   : > { %3645 = vmatpush3.bf16.msra.mxu0 %v1247_v4  ;;  %v1186_v29 = vmul.f32 %v4268_v18, %v4167_v13  ;;  %v4282_v30 = vrot.slane %v563_v19, %v4170_v14  ;;  %v4286_v31 = vrot.slane %v4204_v33, %v4170_v14  ;;  %v4289_v32 = vrot.slane %v603_v20, %v4170_v14 }
  0x27   : > { %3657 = vmatpush3.bf16.msra.mxu1 %v1251_v6  ;;  %3646 = vmatprep.subr.bf16.mxu0 %v6052_v2  ;;  %v1193_v34 = vmul.f32 %v4272_v22, %v4173_v15  ;;  %v1187_v35 = vmul.f32 %v4277_v27, %v4167_v13  ;;  %v4297_v37 = vrot.slane %v565_v28, %v4170_v14 }
  0x28   : > { %3658 = vmatprep.subr.bf16.mxu1 %v6052_v2  ;;  %v1194_v38 = vmul.f32 %v4282_v30, %v4173_v15  ;;  %v1196_v40 = vmul.f32 %v4286_v31, %v4176_v16  ;;  %v1197_v41 = vmul.f32 %v4289_v32, %v4176_v16  ;;  %v630_v42 = vcombine.high %v4193_v23, %v4193_v23 }
  0x29   : > { %v1252_v44 = vpack.c.bf16 %v1193_v34, %v1192_v26  ;;  %v1249_v45 = vpack.c.bf16 %v1187_v35, %v1186_v29  ;;  %v1195_v13 = vmul.f32 %v4297_v37, %v4173_v15  ;;  %v638_v47 = vrot.slane %v4193_v23, %v4156_v11 }
  0x2a   : > { %3647 = vmatpush3.bf16.msra.mxu0 %v1248_v17  ;;  %v1254_v50 = vpack.c.bf16 %v1197_v41, %v1196_v40  ;;  %v652_v53 = vrot.slane %v630_v42, %v4156_v11  ;;  %v611_v54 = vcombine.high %v4204_v33, %v4204_v33  ;;  %v613_v55 = vcombine.high %v603_v20, %v603_v20  ;;  %v4361_v17 = vld [vmem:[%s4164_s23 + $0x20] sm:$0xff] }
  0x2b   : > { %3659 = vmatpush3.bf16.msra.mxu1 %v1252_v44  ;;  %3648 = vmatprep.subr.bf16.mxu0 %v6052_v2  ;;  %v1253_v56 = vpack.c.bf16 %v1195_v13, %v1194_v38  ;;  %v4317_v58 = vrot.slane %v638_v47, %v4170_v14  ;;  %v660_v15 = vcombine.high %v638_v47, %v638_v47 }
  0x2c   : > { %3660 = vmatprep.subr.bf16.mxu1 %v6052_v2  ;;  %v4321_v23 = vrot.slane %v652_v53, %v4170_v14  ;;  %v4324_v59 = vrot.slane %v611_v54, %v4170_v14  ;;  %v4327_v33 = vrot.slane %v613_v55, %v4170_v14  ;;  %v662_v60 = vcombine.high %v652_v53, %v652_v53 }
  0x2d   : > { %v1204_v63 = vmul.f32 %v4317_v58, %v4187_v21  ;;  %v4337_v0 = vrot.slane %v660_v15, %v4170_v14  ;;  %v580_v3 = vrot.slane %v566_v24, %v4156_v11  ;;  %v629_v4 = vrot.slane %v615_v25, %v4156_v11 }
  0x2e   : > { %3649 = vmatpush3.bf16.msra.mxu0 %v1249_v45  ;;  %v1205_v6 = vmul.f32 %v4321_v23, %v4187_v21  ;;  %v1198_v7 = vmul.f32 %v4324_v59, %v4176_v16  ;;  %v1199_v8 = vmul.f32 %v4327_v33, %v4176_v16  ;;  %v4354_v9 = vrot.slane %v662_v60, %v4170_v14 }
  0x2f   : > { %3661 = vmatpush3.bf16.msra.mxu1 %v1253_v56  ;;  %3666 = vmatprep.subr.bf16.mxu0 %v6052_v2  ;;  %v1206_v24 = vmul.f32 %v4337_v0, %v4187_v21  ;;  %v582_v25 = vcombine.high %v580_v3, %v580_v3  ;;  %v596_v12 = vrot.slane %v580_v3, %v4156_v11 }
  0x30   : > { %3678 = vmatprep.subr.bf16.mxu1 %v6052_v2  ;;  %v1258_v19 = vpack.c.bf16 %v1205_v6, %v1204_v63  ;;  %v1255_v20 = vpack.c.bf16 %v1199_v8, %v1198_v7  ;;  %v1207_v26 = vmul.f32 %v4354_v9, %v4187_v21  ;;  %v631_v28 = vcombine.high %v629_v4, %v629_v4  ;;  %v4413_v6 = vld [vmem:[%s4164_s23 + $0x28] sm:$0xff] }
  0x31   : > { %3651 = vmatmul.mubr.msk.bf16.vlgmr.msra.gmra.mrb[0].mxu0 %vm1295_vm1, %v4332_v62  ;;  %v610_v29 = vrot.slane %v582_v25, %v4156_v11  ;;  %v4370_v34 = vrot.slane %v596_v12, %v4170_v14  ;;  %v645_v35 = vrot.slane %v629_v4, %v4156_v11  ;;  %v612_v38 = vcombine.high %v596_v12, %v596_v12 }
  0x32   : > { %3663 = vmatmul.mubr.msk.bf16.vlgmr.msra.gmra.mrb[0].mxu1 %vm1295_vm1, %v4332_v62  ;;  %3667 = vmatpush3.bf16.msra.mxu0 %v1254_v50  ;;  %v1259_v40 = vpack.c.bf16 %v1207_v26, %v1206_v24  ;;  %v659_v41 = vrot.slane %v631_v28, %v4156_v11  ;;  %v671_v42 = vrot.slane %v4361_v17, %v4156_v11 }
  0x33   : > { %3679 = vmatpush3.bf16.msra.mxu1 %v1258_v19  ;;  %3668 = vmatprep.subr.bf16.mxu0 %v6052_v2  ;;  %v4380_v44 = vrot.slane %v610_v29, %v4170_v14  ;;  %v1200_v45 = vmul.f32 %v4370_v34, %v4176_v16  ;;  %v4385_v13 = vrot.slane %v645_v35, %v4170_v14 }
  0x34   : > { %3680 = vmatprep.subr.bf16.mxu1 %v6052_v2  ;;  %v4389_v47 = vrot.slane %v659_v41, %v4170_v14  ;;  %v614_v50 = vcombine.high %v610_v29, %v610_v29  ;;  %v4392_v53 = vrot.slane %v612_v38, %v4170_v14  ;;  %v661_v54 = vcombine.high %v645_v35, %v645_v35 }
  0x35   : > { %v1201_v55 = vmul.f32 %v4380_v44, %v4176_v16  ;;  %v1208_v56 = vmul.f32 %v4385_v13, %v4187_v21  ;;  %v663_v15 = vcombine.high %v659_v41, %v659_v41  ;;  %3674 = vmatprep.mubr.msk.bf16.mxu0 %vm4050_vm0, %v6052_v2  ;;  %3686 = vmatprep.mubr.msk.bf16.mxu1 %vm4050_vm0, %v6052_v2 }
  0x36   : > { %3669 = vmatpush3.bf16.msra.mxu0 %v1255_v20  ;;  %v1209_v60 = vmul.f32 %v4389_v47, %v4187_v21  ;;  %v4405_v63 = vrot.slane %v614_v50, %v4170_v14  ;;  %v1202_v3 = vmul.f32 %v4392_v53, %v4176_v16  ;;  %v4410_v4 = vrot.slane %v661_v54, %v4170_v14 }
  0x37   : > { %3681 = vmatpush3.bf16.msra.mxu1 %v1259_v40  ;;  %3670 = vmatprep.subr.bf16.mxu0 %v6052_v2  ;;  %v1256_v7 = vpack.c.bf16 %v1201_v55, %v1200_v45  ;;  %v4417_v8 = vrot.slane %v663_v15, %v4170_v14  ;;  %v679_v24 = vcombine.high %v671_v42, %v671_v42 }
  0x38   : > { %3682 = vmatprep.subr.bf16.mxu1 %v6052_v2  ;;  %v1260_v25 = vpack.c.bf16 %v1209_v60, %v1208_v56  ;;  %v1203_v12 = vmul.f32 %v4405_v63, %v4176_v16  ;;  %v1210_v19 = vmul.f32 %v4410_v4, %v4187_v21  ;;  %v687_v20 = vrot.slane %v671_v42, %v4156_v11 }
  0x39   : > { %v1211_v26 = vmul.f32 %v4417_v8, %v4187_v21  ;;  %v701_v28 = vrot.slane %v679_v24, %v4156_v11  ;;  %v720_v29 = vrot.slane %v4413_v6, %v4156_v11  ;;  %v664_v35 = vcombine.high %v4361_v17, %v4361_v17 }
  0x3a   : > { %3671 = vmatpush3.bf16.msra.mxu0 %v1256_v7  ;;  %v1257_v38 = vpack.c.bf16 %v1203_v12, %v1202_v3  ;;  %v4433_v16 = vrot.slane %v687_v20, %v4170_v14  ;;  %v709_v40 = vcombine.high %v687_v20, %v687_v20  ;;  %v713_v41 = vcombine.high %v4413_v6, %v4413_v6 }
  0x3b   : > { %3683 = vmatpush3.bf16.msra.mxu1 %v1260_v25  ;;  %3672 = vmatprep.subr.bf16.mxu0 %v6052_v2  ;;  %v1261_v21 = vpack.c.bf16 %v1211_v26, %v1210_v19  ;;  %v4439_v42 = vrot.slane %v701_v28, %v4170_v14  ;;  %v728_v45 = vcombine.high %v720_v29, %v720_v29 }
  0x3c   : > { %3684 = vmatprep.subr.bf16.mxu1 %v6052_v2  ;;  %v1212_v50 = vmul.f32 %v4433_v16, %v4361_v17  ;;  %v736_v54 = vrot.slane %v720_v29, %v4156_v11  ;;  %v711_v55 = vcombine.high %v701_v28, %v701_v28  ;;  %v4446_v56 = vrot.slane %v709_v40, %v4170_v14 }
  0x3d   : > { %v1213_v15 = vmul.f32 %v4439_v42, %v4361_v17  ;;  %v750_v60 = vrot.slane %v728_v45, %v4156_v11  ;;  %v678_v3 = vrot.slane %v664_v35, %v4156_v11  ;;  %v727_v7 = vrot.slane %v713_v41, %v4156_v11 }
  0x3e   : > { %3673 = vmatpush3.bf16.msra.mxu0 %v1257_v38  ;;  %v4454_v24 = vrot.slane %v736_v54, %v4170_v14  ;;  %v4457_v25 = vrot.slane %v711_v55, %v4170_v14  ;;  %v1214_v12 = vmul.f32 %v4446_v56, %v4361_v17  ;;  %v758_v19 = vcombine.high %v736_v54, %v736_v54 }
  0x3f   : > { %3685 = vmatpush3.bf16.msra.mxu1 %v1261_v21  ;;  %3690 = vmatprep.subr.bf16.mxu0 %v6052_v2  ;;  %v1262_v20 = vpack.c.bf16 %v1213_v15, %v1212_v50  ;;  %v4463_v26 = vrot.slane %v750_v60, %v4170_v14  ;;  %v760_v28 = vcombine.high %v750_v60, %v750_v60 }
  0x40   : > { %6089 = vst [vmem:[#allocation4_spill] sm:$0xff] %v4457_v25  ;;  %3702 = vmatprep.subr.bf16.mxu1 %v6052_v2  ;;  %v1220_v29 = vmul.f32 %v4454_v24, %v4413_v6  ;;  %v1215_v35 = vmul.f32 %v4457_v25, %v4361_v17  ;;  %v4471_v38 = vrot.slane %v758_v19, %v4170_v14 }
  0x41   : > { %v680_v40 = vcombine.high %v678_v3, %v678_v3  ;;  %3675 = vmatmul.mubr.msk.bf16.vlgmr.msra.gmra.mrb[4].mxu0 %vm1295_vm1, %v4332_v62  ;;  %v1221_v41 = vmul.f32 %v4463_v26, %v4413_v6  ;;  %v4478_v21 = vrot.slane %v760_v28, %v4170_v14  ;;  %v694_v45 = vrot.slane %v678_v3, %v4156_v11 }
  0x42   : > { %v729_v50 = vcombine.high %v727_v7, %v727_v7  ;;  %3687 = vmatmul.mubr.msk.bf16.vlgmr.msra.gmra.mrb[4].mxu1 %vm1295_vm1, %v4332_v62  ;;  %3691 = vmatpush3.bf16.msra.mxu0 %v1262_v20  ;;  %v1263_v54 = vpack.c.bf16 %v1215_v35, %v1214_v12  ;;  %v1222_v55 = vmul.f32 %v4471_v38, %v4413_v6 }
  0x43   : > { %6090 = vst [vmem:[#allocation5_spill] sm:$0xff] %v4478_v21  ;;  %v708_v15 = vrot.slane %v680_v40, %v4156_v11  ;;  %v1266_v60 = vpack.c.bf16 %v1221_v41, %v1220_v29  ;;  %3692 = vmatprep.subr.bf16.mxu0 %v6052_v2  ;;  %v1223_v19 = vmul.f32 %v4478_v21, %v4413_v6 }
  0x44   : > { %v4490_v3 = vrot.slane %v694_v45, %v4170_v14  ;;  %v743_v28 = vrot.slane %v727_v7, %v4156_v11  ;;  %v757_v12 = vrot.slane %v729_v50, %v4156_v11  ;;  %v710_v35 = vcombine.high %v694_v45, %v694_v45  ;;  %3698 = vmatprep.mubr.msk.bf16.mxu0 %vm4050_vm0, %v6052_v2 }
  0x45   : > { %v4494_v20 = vrot.slane %v708_v15, %v4170_v14  ;;  %v712_v40 = vcombine.high %v708_v15, %v708_v15  ;;  %3703 = vmatpush3.bf16.msra.mxu1 %v1266_v60  ;;  %v1267_v29 = vpack.c.bf16 %v1223_v19, %v1222_v55  ;;  %v4517_v15 = vld [vmem:[%s4164_s23 + $0x38] sm:$0xff]  ;;  %3710 = vmatprep.mubr.msk.bf16.mxu1 %vm4050_vm0, %v6052_v2 }
  0x46   : > { %6091 = vst [vmem:[#allocation6_spill] sm:$0xff] %v4490_v3  ;;  %v1216_v41 = vmul.f32 %v4490_v3, %v4361_v17  ;;  %v4502_v1 = vrot.slane %v743_v28, %v4170_v14  ;;  %v759_v7 = vcombine.high %v743_v28, %v743_v28  ;;  %3704 = vmatprep.subr.bf16.mxu1 %v6052_v2 }
  0x47   : > { %6092 = vst [vmem:[#allocation7_spill] sm:$0xff] %v4494_v20  ;;  %3693 = vmatpush3.bf16.msra.mxu0 %v1263_v54  ;;  %v1217_v45 = vmul.f32 %v4494_v20, %v4361_v17  ;;  %v4511_v50 = vrot.slane %v757_v12, %v4170_v14  ;;  %v4514_v55 = vrot.slane %v710_v35, %v4170_v14 }
  0x48   : > { %6093 = vst [vmem:[#allocation8_spill] sm:$0xff] %v4502_v1  ;;  %3694 = vmatprep.subr.bf16.mxu0 %v6052_v2  ;;  %v1224_v60 = vmul.f32 %v4502_v1, %v4413_v6  ;;  %v4523_v19 = vrot.slane %v712_v40, %v4170_v14  ;;  %v761_v54 = vcombine.high %v757_v12, %v757_v12 }
  0x49   : > { %6094 = vst [vmem:[#allocation9_spill] sm:$0xff] %v4511_v50  ;;  %6095 = vst [vmem:[#allocation10_spill] sm:$0xff] %v4514_v55  ;;  %v4526_v28 = vrot.slane %v759_v7, %v4170_v14  ;;  %v1264_v20 = vpack.c.bf16 %v1217_v45, %v1216_v41  ;;  %v1225_v3 = vmul.f32 %v4511_v50, %v4413_v6  ;;  %3705 = vmatpush3.bf16.msra.mxu1 %v1267_v29 }
  0x4a   : > { %6096 = vst [vmem:[#allocation11_spill] sm:$0xff] %v4523_v19  ;;  %v1218_v35 = vmul.f32 %v4514_v55, %v4361_v17  ;;  %v769_v1 = vrot.slane %v4505_v5, %v4156_v11  ;;  %v1219_v12 = vmul.f32 %v4523_v19, %v4361_v17  ;;  %v4539_v40 = vrot.slane %v761_v54, %v4170_v14 }
  0x4b   : > { %6097 = vst [vmem:[#allocation12_spill] sm:$0xff] %v4526_v28  ;;  %v1226_v41 = vmul.f32 %v4526_v28, %v4413_v6  ;;  %v818_v7 = vrot.slane %v4517_v15, %v4156_v11  ;;  %3706 = vmatprep.subr.bf16.mxu1 %v6052_v2  ;;  %3695 = vmatpush3.bf16.msra.mxu0 %v1264_v20 }
  0x4c   : > { %v1268_v45 = vpack.c.bf16 %v1225_v3, %v1224_v60  ;;  %v777_v55 = vcombine.high %v769_v1, %v769_v1  ;;  %v785_v50 = vrot.slane %v769_v1, %v4156_v11  ;;  %3696 = vmatprep.subr.bf16.mxu0 %v6052_v2  ;;  %v1265_v29 = vpack.c.bf16 %v1219_v12, %v1218_v35 }
  0x4d   : > { %v1227_v17 = vmul.f32 %v4539_v40, %v4413_v6  ;;  %v826_v54 = vcombine.high %v818_v7, %v818_v7  ;;  %v834_v19 = vrot.slane %v818_v7, %v4156_v11  ;;  %v762_v3 = vcombine.high %v4505_v5, %v4505_v5 }
  0x4e   : > { %v799_v28 = vrot.slane %v777_v55, %v4156_v11  ;;  %v4553_v21 = vrot.slane %v785_v50, %v4170_v14  ;;  %v807_v25 = vcombine.high %v785_v50, %v785_v50  ;;  %3707 = vmatpush3.bf16.msra.mxu1 %v1268_v45 }
  0x4f   : > { %v1269_v1 = vpack.c.bf16 %v1227_v17, %v1226_v41  ;;  %v848_v20 = vrot.slane %v826_v54, %v4156_v11  ;;  %v4559_v60 = vrot.slane %v834_v19, %v4170_v14  ;;  %v856_v6 = vcombine.high %v834_v19, %v834_v19  ;;  %3708 = vmatprep.subr.bf16.mxu1 %v6052_v2 }
  0x50   : > { %3697 = vmatpush3.bf16.msra.mxu0 %v1265_v29  ;;  %v4563_v55 = vrot.slane %v799_v28, %v4170_v14  ;;  %v1228_v50 = vmul.f32 %v4553_v21, %v4505_v5  ;;  %v809_v35 = vcombine.high %v799_v28, %v799_v28  ;;  %v4574_v19 = vrot.slane %v807_v25, %v4170_v14 }
  0x51   : > { %6098 = vst [vmem:[#allocation13_spill] sm:$0xff] %v4559_v60  ;;  %3714 = vmatprep.subr.bf16.mxu0 %v6052_v2  ;;  %v4569_v12 = vrot.slane %v848_v20, %v4170_v14  ;;  %v1236_v41 = vmul.f32 %v4559_v60, %v4517_v15  ;;  %v858_v7 = vcombine.high %v848_v20, %v848_v20 }
  0x52   : > { %6099 = vst [vmem:[#allocation14_spill] sm:$0xff] %v4563_v55  ;;  %v1229_v45 = vmul.f32 %v4563_v55, %v4505_v5  ;;  %v4579_v29 = vrot.slane %v809_v35, %v4170_v14  ;;  %v4582_v28 = vrot.slane %v856_v6, %v4170_v14  ;;  %v776_v17 = vrot.slane %v762_v3, %v4156_v11 }
  0x53   : > { %6100 = vst [vmem:[#allocation15_spill] sm:$0xff] %v4569_v12  ;;  %3709 = vmatpush3.bf16.msra.mxu1 %v1269_v1  ;;  %3699 = vmatmul.mubr.msk.bf16.vlgmr.msra.gmra.mrb[8].mxu0 %vm1295_vm1, %v4332_v62  ;;  %v1237_v25 = vmul.f32 %v4569_v12, %v4517_v15  ;;  %v1230_v54 = vmul.f32 %v4574_v19, %v4505_v5 }
  0x54   : > { %6101 = vst [vmem:[#allocation16_spill] sm:$0xff] %v4579_v29  ;;  %6102 = vst [vmem:[#allocation17_spill] sm:$0xff] %v4582_v28  ;;  %v4592_v20 = vrot.slane %v858_v7, %v4170_v14  ;;  %3726 = vmatprep.subr.bf16.mxu1 %v6052_v2  ;;  %v1270_v35 = vpack.c.bf16 %v1229_v45, %v1228_v50  ;;  %v1231_v6 = vmul.f32 %v4579_v29, %v4505_v5 }
  0x55   : > { %v1238_v3 = vmul.f32 %v4582_v28, %v4517_v15  ;;  %v778_v1 = vcombine.high %v776_v17, %v776_v17  ;;  %v1274_v60 = vpack.c.bf16 %v1237_v25, %v1236_v41  ;;  %v792_v55 = vrot.slane %v776_v17, %v4156_v11  ;;  %3722 = vmatprep.mubr.msk.bf16.mxu0 %vm4050_vm0, %v6052_v2 }
  0x56   : > { %6103 = vst [vmem:[#allocation18_spill] sm:$0xff] %v4592_v20  ;;  %v1239_v12 = vmul.f32 %v4592_v20, %v4517_v15  ;;  %v811_v7 = vcombine.high %v4517_v15, %v4517_v15  ;;  %3711 = vmatmul.mubr.msk.bf16.vlgmr.msra.gmra.mrb[8].mxu1 %vm1295_vm1, %v4332_v62  ;;  %3715 = vmatpush3.bf16.msra.mxu0 %v1270_v35 }
  0x57   : > { %v1271_v50 = vpack.c.bf16 %v1231_v6, %v1230_v54  ;;  %v806_v45 = vrot.slane %v778_v1, %v4156_v11  ;;  %3727 = vmatpush3.bf16.msra.mxu1 %v1274_v60  ;;  %3716 = vmatprep.subr.bf16.mxu0 %v6052_v2  ;;  %v4611_v25 = vrot.slane %v792_v55, %v4170_v14 }
  0x58   : > { %v1275_v41 = vpack.c.bf16 %v1239_v12, %v1238_v3  ;;  %v825_v17 = vrot.slane %v811_v7, %v4156_v11  ;;  %3728 = vmatprep.subr.bf16.mxu1 %v6052_v2  ;;  %v808_v28 = vcombine.high %v792_v55, %v792_v55  ;;  %3734 = vmatprep.mubr.msk.bf16.mxu1 %vm4050_vm0, %v6052_v2 }
  0x59   : > { %6104 = vst [vmem:[#allocation19_spill] sm:$0xff] %v4611_v25  ;;  %v4616_v20 = vrot.slane %v806_v45, %v4170_v14  ;;  %v810_v29 = vcombine.high %v806_v45, %v806_v45  ;;  %v1232_v60 = vmul.f32 %v4611_v25, %v4505_v5 }
  0x5a   : > { %v827_v54 = vcombine.high %v825_v17, %v825_v17  ;;  %v841_v12 = vrot.slane %v825_v17, %v4156_v11  ;;  %3717 = vmatpush3.bf16.msra.mxu0 %v1271_v50  ;;  %v4626_v6 = vrot.slane %v808_v28, %v4170_v14 }
  0x5b   : > { %6105 = vst [vmem:[#allocation20_spill] sm:$0xff] %v4616_v20  ;;  %v1233_v35 = vmul.f32 %v4616_v20, %v4505_v5  ;;  %v4629_v3 = vrot.slane %v810_v29, %v4170_v14  ;;  %3729 = vmatpush3.bf16.msra.mxu1 %v1275_v41  ;;  %3718 = vmatprep.subr.bf16.mxu0 %v6052_v2 }
  0x5c   : > { %6106 = vst [vmem:[#allocation21_spill] sm:$0xff] %v4626_v6  ;;  %v855_v55 = vrot.slane %v827_v54, %v4156_v11  ;;  %v4634_v1 = vrot.slane %v841_v12, %v4170_v14  ;;  %v857_v7 = vcombine.high %v841_v12, %v841_v12  ;;  %3730 = vmatprep.subr.bf16.mxu1 %v6052_v2 }
  0x5d   : > { %6107 = vst [vmem:[#allocation22_spill] sm:$0xff] %v4629_v3  ;;  %v1272_v50 = vpack.c.bf16 %v1233_v35, %v1232_v60  ;;  %v1234_v45 = vmul.f32 %v4626_v6, %v4505_v5  ;;  %v1235_v28 = vmul.f32 %v4629_v3, %v4505_v5 }
  0x5e   : > { %6108 = vst [vmem:[#allocation23_spill] sm:$0xff] %v4634_v1  ;;  %v4642_v29 = vrot.slane %v855_v55, %v4170_v14  ;;  %v1240_v41 = vmul.f32 %v4634_v1, %v4517_v15  ;;  %v859_v11 = vcombine.high %v855_v55, %v855_v55  ;;  %v4647_v17 = vrot.slane %v857_v7, %v4170_v14 }
  0x5f   : > { %3719 = vmatpush3.bf16.msra.mxu0 %v1272_v50  ;;  %v1273_v54 = vpack.c.bf16 %v1235_v28, %v1234_v45 }
  0x60   : > { %6109 = vst [vmem:[#allocation24_spill] sm:$0xff] %v4642_v29  ;;  %6110 = vst [vmem:[#allocation25_spill] sm:$0xff] %v4647_v17  ;;  %v1241_v60 = vmul.f32 %v4642_v29, %v4517_v15  ;;  %3720 = vmatprep.subr.bf16.mxu0 %v6052_v2  ;;  %v4653_v12 = vrot.slane %v859_v11, %v4170_v14  ;;  %v1242_v5 = vmul.f32 %v4647_v17, %v4517_v15 }
  0x62   : > { %6111 = vst [vmem:[#allocation26_spill] sm:$0xff] %v4653_v12  ;;  %v1276_v35 = vpack.c.bf16 %v1241_v60, %v1240_v41  ;;  %v1243_v55 = vmul.f32 %v4653_v12, %v4517_v15 }
  0x63   : > { %3721 = vmatpush3.bf16.msra.mxu0 %v1273_v54 }
  0x64   : > { %3731 = vmatpush3.bf16.msra.mxu1 %v1276_v35  ;;  %v1277_v7 = vpack.c.bf16 %v1243_v55, %v1242_v5  ;;  %3738 = vmatprep.subr.bf16.mxu0 %v6052_v2 }
  0x65   : > { %3732 = vmatprep.subr.bf16.mxu1 %v6052_v2 }
  0x66   : > { %3723 = vmatmul.mubr.msk.bf16.vlgmr.msra.gmra.mrb[12].mxu0 %vm1295_vm1, %v4332_v62 }
  0x67   : > { %3754 = vmatprep.mubr.msk.bf16.mxu0 %vm4050_vm0, %v6052_v2 }
  0x68   : > { %3733 = vmatpush3.bf16.msra.mxu1 %v1277_v7 }
  0x69   : > { %3758 = vmatprep.subr.bf16.mxu1 %v6052_v2 }
  0x6b   : > { %3735 = vmatmul.mubr.msk.bf16.vlgmr.msra.gmra.mrb[12].mxu1 %vm1295_vm1, %v4332_v62 }
  0x6c   : > { %3774 = vmatprep.mubr.msk.bf16.mxu1 %vm4050_vm0, %v6052_v2 }
  0x92   : > { %v4670_v14 = vpop.permute.xlu0 %1282 }
  0x96   : > { %v4672_v15 = vpop.permute.xlu0 %1287 }
 0x104   : > { %v1333_v50 = vpop.f32.mrb[0].mxu0 }
 0x105   : > { %v1334_v45 = vadd.f32 %v1333_v50, %v4670_v14  ;;  %v1374_v28 = vpop.f32.mrb[0].mxu1  ;;  %v3652_v41 = vpop.f32.mrb[1].mxu0 }
 0x106   : > { %v1375_v11 = vadd.f32 %v1374_v28, %v4670_v14  ;;  %v3664_v54 = vpop.f32.mrb[1].mxu1  ;;  %v1336_v60 = vpop.f32.mrb[2].mxu0 }
 0x107   : > { %v4676_v5 = vmax.f32 %v1334_v45, 0.0  ;;  %v1337_v62 = vadd.f32 %v1336_v60, %v4672_v15  ;;  %v1377_v35 = vpop.f32.mrb[2].mxu1  ;;  %v3653_v55 = vpop.f32.mrb[3].mxu0 }
 0x108   : > { %v4679_v7 = vmax.f32 %v1375_v11, 0.0  ;;  %v1378_v2 = vadd.f32 %v1377_v35, %v4672_v15  ;;  %v3665_v12 = vpop.f32.mrb[3].mxu1 }
 0x109   : > { %v4682_v3 = vmax.f32 %v1337_v62, 0.0  ;;  %v2200_v50 = vsel %vm2199_vm2, %v4676_v5, 0.0  ;;  %v1643_v28 = vmul.f32 %v4676_v5, %v4208_v36  ;;  %v1645_v45 = vmul.f32 %v4676_v5, %v4216_v43 }
 0x10a   : > { %v4690_v41 = vmax.f32 %v1378_v2, 0.0  ;;  %2201 = vadd.xlane.f32.xlu1 %v2200_v50  ;;  %v2206_v11 = vsel %vm2199_vm2, %v4679_v7, 0.0  ;;  %v1659_v12 = vmul.f32 %v4679_v7, %v4212_v39  ;;  %v1661_v54 = vmul.f32 %v4679_v7, %v4221_v46 }
 0x10b   : > { %v2203_v60 = vsel %vm2199_vm2, %v4682_v3, 0.0  ;;  %v1644_v62 = vmul.f32 %v4682_v3, %v4208_v36  ;;  %v1646_v2 = vmul.f32 %v4682_v3, %v4216_v43  ;;  %v1647_v35 = vmul.f32 %v4676_v5, %v4226_v48 }
 0x10c   : > { %2204 = vadd.xlane.f32.xlu0 %v2203_v60  ;;  %v1660_v55 = vmul.f32 %v4690_v41, %v4212_v39  ;;  %v2209_v50 = vsel %vm2199_vm2, %v4690_v41, 0.0  ;;  %v1662_v17 = vmul.f32 %v4690_v41, %v4221_v46  ;;  %v1648_v6 = vmul.f32 %v4682_v3, %v4226_v48 }
 0x10d   : > { %v1773_v36 = vpack.c.bf16 %v1644_v62, %v1643_v28  ;;  %v1774_v29 = vpack.c.bf16 %v1646_v2, %v1645_v45  ;;  %v1663_v43 = vmul.f32 %v4679_v7, %v4229_v49  ;;  %v1664_v60 = vmul.f32 %v4690_v41, %v4229_v49 }
 0x10e   : > { %2207 = vadd.xlane.f32.xlu1 %v2206_v11  ;;  %v1781_v20 = vpack.c.bf16 %v1660_v55, %v1659_v12  ;;  %v1782_v39 = vpack.c.bf16 %v1662_v17, %v1661_v54  ;;  %v1775_v1 = vpack.c.bf16 %v1648_v6, %v1647_v35  ;;  %v4720_v25 = vmul.f32 %v4676_v5, %v4234_v51 }
 0x10f   : > { %3739 = vmatpush3.bf16.msra.mxu0 %v1773_v36  ;;  %v1783_v46 = vpack.c.bf16 %v1664_v60, %v1663_v43  ;;  %v1650_v48 = vmul.f32 %v4682_v3, %v4234_v51  ;;  %v4726_v28 = vmul.f32 %v4679_v7, %v4237_v52  ;;  %v4730_v49 = vmul.f32 %v4690_v41, %v4237_v52 }
 0x110   : > { %3759 = vmatpush3.bf16.msra.mxu1 %v1781_v20  ;;  %2210 = vadd.xlane.f32.xlu0 %v2209_v50  ;;  %v4734_v6 = vmul.f32 %v4676_v5, %v4247_v57  ;;  %v4738_v17 = vmul.f32 %v4682_v3, %v4247_v57  ;;  %v4742_v51 = vmul.f32 %v4679_v7, %v4264_v10  ;;  %v6112_v45 = vmov 0.0  }
 0x111   : > { %3740 = vmatprep.subr.bf16.mxu0 %v6112_v45  ;;  %3760 = vmatprep.subr.bf16.mxu1 %v6112_v45  ;;  %v1776_v52 = vpack.c.bf16 %v1650_v48, %v4720_v25  ;;  %v1784_v20 = vpack.c.bf16 %v4730_v49, %v4726_v28  ;;  %v4751_v11 = vmul.f32 %v4690_v41, %v4264_v10 }
 0x112   : > { %v1777_v57 = vpack.c.bf16 %v4738_v17, %v4734_v6  ;;  %v4757_v12 = vmul.f32 %v4676_v5, %v4254_v61  ;;  %v4761_v54 = vmul.f32 %v4682_v3, %v4254_v61  ;;  %v4765_v25 = vmul.f32 %v4679_v7, %v4272_v22 }
 0x113   : > { %3741 = vmatpush3.bf16.msra.mxu0 %v1774_v29  ;;  %v1785_v10 = vpack.c.bf16 %v4751_v11, %v4742_v51  ;;  %v4771_v62 = vmul.f32 %v4690_v41, %v4272_v22  ;;  %v4775_v2 = vmul.f32 %v4676_v5, %v4268_v18  ;;  %v4779_v61 = vmul.f32 %v4682_v3, %v4268_v18 }
 0x114   : > { %3761 = vmatpush3.bf16.msra.mxu1 %v1782_v39  ;;  %v1415_v35 = vpop.f32.mrb[4].mxu0  ;;  %3742 = vmatprep.subr.bf16.mxu0 %v6112_v45  ;;  %v1778_v29 = vpack.c.bf16 %v4761_v54, %v4757_v12  ;;  %v4786_v55 = vmul.f32 %v4679_v7, %v4282_v30  ;;  %v4790_v22 = vmul.f32 %v4690_v41, %v4282_v30 }
 0x115   : > { %v1416_v50 = vadd.f32 %v1415_v35, %v4670_v14  ;;  %v1456_v36 = vpop.f32.mrb[4].mxu1  ;;  %v3676_v18 = vpop.f32.mrb[5].mxu0  ;;  %3762 = vmatprep.subr.bf16.mxu1 %v6112_v45  ;;  %v4803_v49 = vmul.f32 %v4676_v5, %v4277_v27  ;;  %v4807_v35 = vmul.f32 %v4682_v3, %v4277_v27  ;;  %v4818_v30 = vmul.f32 %v4690_v41, %v4297_v37 }
 0x116   : > { %v1457_v39 = vadd.f32 %v1456_v36, %v4670_v14  ;;  %v3688_v48 = vpop.f32.mrb[5].mxu1  ;;  %v1418_v28 = vpop.f32.mrb[6].mxu0 }
 0x117   : > { %v4809_v18 = vmax.f32 %v1416_v50, 0.0  ;;  %v1419_v43 = vadd.f32 %v1418_v28, %v4672_v15  ;;  %v1459_v60 = vpop.f32.mrb[6].mxu1  ;;  %3743 = vmatpush3.bf16.msra.mxu0 %v1775_v1  ;;  %v3677_v36 = vpop.f32.mrb[7].mxu0  ;;  %v4814_v48 = vmul.f32 %v4679_v7, %v4297_v37 }
 0x118   : > { %v4820_v5 = vmax.f32 %v1457_v39, 0.0  ;;  %v1460_v27 = vadd.f32 %v1459_v60, %v4672_v15  ;;  %3763 = vmatpush3.bf16.msra.mxu1 %v1783_v46  ;;  %3744 = vmatprep.subr.bf16.mxu0 %v6112_v45  ;;  %v3689_v3 = vpop.f32.mrb[7].mxu1 }
 0x119   : > { %v4826_v50 = vmax.f32 %v1419_v43, 0.0  ;;  %3764 = vmatprep.subr.bf16.mxu1 %v6112_v45  ;;  %v2212_v7 = vsel %vm2199_vm2, %v4809_v18, 0.0  ;;  %v4837_v46 = vmul.f32 %v4809_v18, %v4286_v31  ;;  %v4845_v43 = vmul.f32 %v4809_v18, %v4289_v32 }
 0x11a   : > { %v4833_v41 = vmax.f32 %v1460_v27, 0.0  ;;  %2213 = vadd.xlane.f32.xlu1 %v2212_v7  ;;  %v4841_v60 = vmul.f32 %v4820_v5, %v4317_v58  ;;  %v4859_v27 = vmul.f32 %v4820_v5, %v4321_v23  ;;  %v4893_v1 = vmul.f32 %v4820_v5, %v4337_v0 }
 0x11b   : > { %3745 = vmatpush3.bf16.msra.mxu0 %v1776_v52  ;;  %v2215_v39 = vsel %vm2199_vm2, %v4826_v50, 0.0  ;;  %v4851_v28 = vmul.f32 %v4826_v50, %v4286_v31  ;;  %v4855_v36 = vmul.f32 %v4826_v50, %v4289_v32  ;;  %v2218_v52 = vsel %vm2199_vm2, %v4820_v5, 0.0 }
 0x11c   : > { %3765 = vmatpush3.bf16.msra.mxu1 %v1784_v20  ;;  %2216 = vadd.xlane.f32.xlu0 %v2215_v39  ;;  %v4865_v3 = vmul.f32 %v4833_v41, %v4317_v58  ;;  %v4869_v31 = vmul.f32 %v4833_v41, %v4321_v23  ;;  %v4873_v32 = vmul.f32 %v4809_v18, %v4324_v59  ;;  %v2221_v20 = vsel %vm2199_vm2, %v4833_v41, 0.0 }
 0x11d   : > { %3746 = vmatprep.subr.bf16.mxu0 %v6112_v45  ;;  %3766 = vmatprep.subr.bf16.mxu1 %v6112_v45  ;;  %v4885_v23 = vmul.f32 %v4826_v50, %v4324_v59  ;;  %v4897_v7 = vmul.f32 %v4833_v41, %v4337_v0  ;;  %v4910_v37 = vmul.f32 %v4826_v50, %v4327_v33 }
 0x11e   : > { %2219 = vadd.xlane.f32.xlu1 %v2218_v52  ;;  %v4906_v52 = vmul.f32 %v4809_v18, %v4327_v33  ;;  %v4914_v58 = vmul.f32 %v4820_v5, %v4354_v9  ;;  %v4923_v6 = vmul.f32 %v4833_v41, %v4354_v9  ;;  %v4927_v33 = vmul.f32 %v4809_v18, %v4370_v34 }
 0x11f   : > { %3747 = vmatpush3.bf16.msra.mxu0 %v1777_v57  ;;  %v4935_v51 = vmul.f32 %v4826_v50, %v4370_v34  ;;  %v4939_v11 = vmul.f32 %v4820_v5, %v4385_v13  ;;  %v4945_v57 = vmul.f32 %v4833_v41, %v4385_v13  ;;  %v4962_v9 = vmul.f32 %v4820_v5, %v4389_v47 }
 0x120   : > { %3767 = vmatpush3.bf16.msra.mxu1 %v1785_v10  ;;  %2222 = vadd.xlane.f32.xlu0 %v2221_v20  ;;  %v4949_v10 = vmul.f32 %v4809_v18, %v4380_v44  ;;  %v4953_v20 = vmul.f32 %v4826_v50, %v4380_v44  ;;  %v4966_v13 = vmul.f32 %v4833_v41, %v4389_v47 }
 0x121   : > { %3748 = vmatprep.subr.bf16.mxu0 %v6112_v45  ;;  %3768 = vmatprep.subr.bf16.mxu1 %v6112_v45  ;;  %v4970_v17 = vmul.f32 %v4809_v18, %v4392_v53  ;;  %v6113_v44 = vpack.c.bf16 %v4771_v62, %v4765_v25  ;;  %v4982_v47 = vmul.f32 %v4826_v50, %v4392_v53 }
 0x122   : > { %v4990_v62 = vmul.f32 %v4820_v5, %v4410_v4  ;;  %v5008_v25 = vmul.f32 %v4820_v5, %v4417_v8  ;;  %v6114_v53 = vpack.c.bf16 %v4779_v61, %v4775_v2 }
 0x123   : > { %3749 = vmatpush3.bf16.msra.mxu0 %v1778_v29 }
 0x124   : > { %3769 = vmatpush3.bf16.msra.mxu1 %v6113_v44  ;;  %3750 = vmatprep.subr.bf16.mxu0 %v6112_v45  ;;  %v4994_v44 = vmul.f32 %v4833_v41, %v4410_v4 }
 0x125   : > { %3770 = vmatprep.subr.bf16.mxu1 %v6112_v45 }
 0x126   : > { %v1497_v12 = vpop.f32.mrb[8].mxu0 }
 0x127   : > { %v1498_v34 = vadd.f32 %v1497_v12, %v4670_v14  ;;  %v3700_v0 = vpop.f32.mrb[9].mxu0  ;;  %v5004_v12 = vmul.f32 %v4826_v50, %v4405_v63  ;;  %3751 = vmatpush3.bf16.msra.mxu0 %v6114_v53 }
 0x128   : > { %v1500_v29 = vpop.f32.mrb[10].mxu0  ;;  %v5000_v0 = vmul.f32 %v4809_v18, %v4405_v63  ;;  %v5020_v63 = vmul.f32 %v4833_v41, %v4417_v8  ;;  %3752 = vmatprep.subr.bf16.mxu0 %v6112_v45  ;;  %v6130_v18 = vld [vmem:[#allocation7_spill] sm:$0xff] }
 0x129   : > { %v5010_v54 = vmax.f32 %v1498_v34, 0.0  ;;  %v1538_v4 = vpop.f32.mrb[8].mxu1  ;;  %v1501_v59 = vadd.f32 %v1500_v29, %v4672_v15  ;;  %v3701_v39 = vpop.f32.mrb[11].mxu0  ;;  %v6115_v34 = vpack.c.bf16 %v4790_v22, %v4786_v55 }
 0x12a   : > { %v1539_v5 = vadd.f32 %v1538_v4, %v4670_v14  ;;  %v3712_v50 = vpop.f32.mrb[9].mxu1 }
 0x12b   : > { %3771 = vmatpush3.bf16.msra.mxu1 %v6115_v34  ;;  %v5029_v61 = vmax.f32 %v1501_v59, 0.0  ;;  %v1541_v39 = vpop.f32.mrb[10].mxu1  ;;  %v2224_v8 = vsel %vm2199_vm2, %v5010_v54, 0.0  ;;  %v5038_v55 = vmul.f32 %v5010_v54, %v4433_v16  ;;  %v5046_v59 = vld [vmem:[%s6008_s3] sm:$0xff]   ;;  %v5050_v4 = vmul.f32 %v5010_v54, %v4439_v42 }
 0x12c   : > { %3772 = vmatprep.subr.bf16.mxu1 %v6112_v45  ;;  %v5040_v22 = vmax.f32 %v1539_v5, 0.0  ;;  %v1542_v29 = vadd.f32 %v1541_v39, %v4672_v15  ;;  %2225 = vadd.xlane.f32.xlu1 %v2224_v8  ;;  %v3713_v53 = vpop.f32.mrb[11].mxu1  ;;  %v5054_v50 = vmul.f32 %v5010_v54, %v4446_v56  ;;  %v6116_v5 = vpack.c.bf16 %v4807_v35, %v4803_v49 }
 0x12d   : > { %v2227_v34 = vsel %vm2199_vm2, %v5029_v61, 0.0  ;;  %v5063_v39 = vmul.f32 %v5029_v61, %v4433_v16  ;;  %v5067_v8 = vmul.f32 %v5029_v61, %v4439_v42  ;;  %v5071_v53 = vmul.f32 %v5029_v61, %v4446_v56 }
 0x12e   : > { %3753 = vmatpush3.bf16.msra.mxu0 %v6116_v5  ;;  %v5073_v41 = vmax.f32 %v1542_v29, 0.0  ;;  %v6117_v49 = vpack.c.bf16 %v4818_v30, %v4814_v48  ;;  %2228 = vadd.xlane.f32.xlu0 %v2227_v34  ;;  %v5080_v35 = vmul.f32 %v5040_v22, %v4454_v24  ;;  %v5084_v16 = vmul.f32 %v5040_v22, %v4463_v26  ;;  %v6119_v48 = vld [vmem:[#allocation4_spill] sm:$0xff] }
 0x12f   : > { %3778 = vmatprep.subr.bf16.mxu0 %v6112_v45  ;;  %v2230_v42 = vsel %vm2199_vm2, %v5040_v22, 0.0  ;;  %v5107_v34 = vmul.f32 %v5040_v22, %v4471_v38  ;;  %v5125_v30 = vmul.f32 %v5029_v61, %v6119_v48  ;;  %v6122_v56 = vpack.c.bf16 %v4865_v3, %v4841_v60 }
 0x130   : > { %3773 = vmatpush3.bf16.msra.mxu1 %v6117_v49  ;;  %2231 = vadd.xlane.f32.xlu1 %v2230_v42  ;;  %v5099_v29 = vmul.f32 %v5073_v41, %v4454_v24  ;;  %v5103_v5 = vmul.f32 %v5073_v41, %v4463_v26  ;;  %v6118_v49 = vpack.c.bf16 %v4851_v28, %v4837_v46  ;;  %v2233_v42 = vsel %vm2199_vm2, %v5073_v41, 0.0  ;;  %v6123_v28 = vld [vmem:[#allocation5_spill] sm:$0xff] }
 0x131   : > { %3798 = vmatprep.subr.bf16.mxu1 %v6112_v45  ;;  %3755 = vmatmul.mubr.bf16.vlgmr.msra.gmra.mrb[16].mxu0 %v5046_v59  ;;  %v5117_v24 = vmul.f32 %v5073_v41, %v4471_v38  ;;  %v5121_v26 = vmul.f32 %v5010_v54, %v6119_v48  ;;  %6121 = vst [vmem:[#allocation27_spill] sm:$0xff] %v5125_v30  ;;  %v6127_v38 = vld [vmem:[#allocation8_spill] sm:$0xff] }
 0x132   : > { %3779 = vmatpush3.bf16.msra.mxu0 %v6118_v49  ;;  %2234 = vadd.xlane.f32.xlu0 %v2233_v42  ;;  %v5136_v49 = vmul.f32 %v5040_v22, %v6123_v28  ;;  %v5146_v3 = vmul.f32 %v5073_v41, %v6123_v28  ;;  %v5162_v60 = vmul.f32 %v5040_v22, %v6127_v38 }
 0x133   : > { %3775 = vmatmul.mubr.bf16.vlgmr.msra.gmra.mrb[16].mxu1 %v5046_v59  ;;  %6120 = vst [vmem:[#allocation4_spill] sm:$0xff] %v5121_v26  ;;  %3780 = vmatprep.subr.bf16.mxu0 %v6112_v45  ;;  %v6129_v28 = vpack.c.bf16 %v4855_v36, %v4845_v43  ;;  %v5171_v2 = vmul.f32 %v5073_v41, %v6127_v38  ;;  %v6134_v36 = vld [vmem:[#allocation9_spill] sm:$0xff] }
 0x134   : > { %3799 = vmatpush3.bf16.msra.mxu1 %v6122_v56  ;;  %3794 = vmatprep.mubr.msk.bf16.mxu0 %vm4050_vm0, %v6112_v45  ;;  %v6124_v56 = vld [vmem:[#allocation6_spill] sm:$0xff]  ;;  %6128 = vst [vmem:[#allocation8_spill] sm:$0xff] %v5162_v60  ;;  %v5175_v26 = vmul.f32 %v5010_v54, %v6130_v18  ;;  %v6133_v30 = vpack.c.bf16 %v4869_v31, %v4859_v27  ;;  %v6139_v60 = vld [vmem:[#allocation11_spill] sm:$0xff] }
 0x135   : > { %3800 = vmatprep.subr.bf16.mxu1 %v6112_v45  ;;  %3814 = vmatprep.mubr.msk.bf16.mxu1 %vm4050_vm0, %v6112_v45  ;;  %v5154_v42 = vmul.f32 %v5010_v54, %v6124_v56  ;;  %v5158_v48 = vmul.f32 %v5029_v61, %v6124_v56  ;;  %v5179_v56 = vmul.f32 %v5029_v61, %v6130_v18  ;;  %v6136_v31 = vld [vmem:[#allocation10_spill] sm:$0xff] }
 0x136   : > { %3781 = vmatpush3.bf16.msra.mxu0 %v6129_v28  ;;  %6131 = vst [vmem:[#allocation7_spill] sm:$0xff] %v5175_v26  ;;  %v5189_v38 = vmul.f32 %v5040_v22, %v6134_v36  ;;  %v5193_v28 = vmul.f32 %v5073_v41, %v6134_v36  ;;  %v5206_v43 = vmul.f32 %v5029_v61, %v6136_v31 }
 0x137   : > { %6125 = vst [vmem:[#allocation5_spill] sm:$0xff] %v5154_v42  ;;  %6126 = vst [vmem:[#allocation6_spill] sm:$0xff] %v5158_v48  ;;  %3782 = vmatprep.subr.bf16.mxu0 %v6112_v45  ;;  %v6137_v42 = vld [vmem:[#allocation12_spill] sm:$0xff]  ;;  %v5226_v36 = vmul.f32 %v5010_v54, %v6139_v60 }
 0x138   : > { %6132 = vst [vmem:[#allocation28_spill] sm:$0xff] %v5179_v56  ;;  %3801 = vmatpush3.bf16.msra.mxu1 %v6133_v30  ;;  %6135 = vst [vmem:[#allocation9_spill] sm:$0xff] %v5189_v38  ;;  %v5202_v30 = vmul.f32 %v5010_v54, %v6136_v31  ;;  %v5212_v48 = vmul.f32 %v5040_v22, %v6137_v42  ;;  %v5216_v18 = vmul.f32 %v5073_v41, %v6137_v42 }
 0x139   : > { %3802 = vmatprep.subr.bf16.mxu1 %v6112_v45  ;;  %v1579_v46 = vpop.f32.mrb[12].mxu0  ;;  %v6138_v56 = vpack.c.bf16 %v4885_v23, %v4873_v32  ;;  %v5230_v38 = vmul.f32 %v5029_v61, %v6139_v60  ;;  %v5240_v23 = vmul.f32 %v5040_v22, %v4539_v40  ;;  %v5244_v54 = vmul.f32 %v5073_v41, %v4539_v40 }
 0x13a   : > { %v1580_v27 = vadd.f32 %v1579_v46, %v4670_v14  ;;  %v3724_v26 = vpop.f32.mrb[13].mxu0  ;;  %v6140_v46 = vpack.c.bf16 %v4897_v7, %v4893_v1  ;;  %v6141_v41 = vpack.c.bf16 %v4910_v37, %v4906_v52  ;;  %v6145_v52 = vld [vmem:[#allocation16_spill] sm:$0xff] }
 0x13b   : > { %3783 = vmatpush3.bf16.msra.mxu0 %v6138_v56  ;;  %v1582_v42 = vpop.f32.mrb[14].mxu0 }
 0x13c   : > { %3803 = vmatpush3.bf16.msra.mxu1 %v6140_v46  ;;  %3784 = vmatprep.subr.bf16.mxu0 %v6112_v45  ;;  %v5246_v61 = vmax.f32 %v1580_v27, 0.0  ;;  %v1583_v26 = vadd.f32 %v1582_v42, %v4672_v15  ;;  %v3725_v1 = vpop.f32.mrb[15].mxu0  ;;  %v6142_v42 = vld [vmem:[#allocation14_spill] sm:$0xff] }
 0x13d   : > { %3804 = vmatprep.subr.bf16.mxu1 %v6112_v45 }
 0x13e   : > { %v1620_v56 = vpop.f32.mrb[12].mxu1  ;;  %v5254_v22 = vmax.f32 %v1583_v26, 0.0  ;;  %v2236_v40 = vsel %vm2199_vm2, %v5246_v61, 0.0  ;;  %v5263_v27 = vmul.f32 %v5246_v61, %v4553_v21  ;;  %v5267_v46 = vmul.f32 %v5246_v61, %v6142_v42 }
 0x13f   : > { %3785 = vmatpush3.bf16.msra.mxu0 %v6141_v41  ;;  %v1621_v1 = vadd.f32 %v1620_v56, %v4670_v14  ;;  %v3736_v60 = vpop.f32.mrb[13].mxu1  ;;  %2237 = vadd.xlane.f32.xlu1 %v2236_v40  ;;  %v6143_v26 = vpack.c.bf16 %v4923_v6, %v4914_v58  ;;  %v5275_v37 = vmul.f32 %v5246_v61, %v4574_v19 }
 0x140   : > { %v5279_v41 = vmul.f32 %v5246_v61, %v6145_v52  ;;  %v1623_v7 = vpop.f32.mrb[14].mxu1  ;;  %v2239_v32 = vsel %vm2199_vm2, %v5254_v22, 0.0  ;;  %3786 = vmatprep.subr.bf16.mxu0 %v6112_v45  ;;  %v5287_v14 = vmul.f32 %v5254_v22, %v4553_v21  ;;  %v5291_v58 = vmul.f32 %v5254_v22, %v6142_v42  ;;  %v6149_v21 = vld [vmem:[#allocation19_spill] sm:$0xff] }
 0x141   : > { %3805 = vmatpush3.bf16.msra.mxu1 %v6143_v26  ;;  %6144 = vst [vmem:[#allocation10_spill] sm:$0xff] %v5275_v37  ;;  %v5295_v6 = vmul.f32 %v5254_v22, %v4574_v19  ;;  %v5297_v60 = vmax.f32 %v1621_v1, 0.0  ;;  %v1624_v56 = vadd.f32 %v1623_v7, %v4672_v15  ;;  %2240 = vadd.xlane.f32.xlu0 %v2239_v32  ;;  %v3737_v40 = vpop.f32.mrb[15].mxu1  ;;  %v6156_v32 = vld [vmem:[#allocation17_spill] sm:$0xff]  ;;  %v6158_v15 = vld [vmem:[#allocation23_spill] sm:$0xff] }
 0x142   : > { %6146 = vst [vmem:[#allocation12_spill] sm:$0xff] %v5279_v41  ;;  %3806 = vmatprep.subr.bf16.mxu1 %v6112_v45  ;;  %v5302_v26 = vmul.f32 %v5254_v22, %v6145_v52  ;;  %v5306_v31 = vmul.f32 %v5246_v61, %v6149_v21  ;;  %v6151_v42 = vpack.c.bf16 %v4935_v51, %v4927_v33  ;;  %v6154_v33 = vld [vmem:[#allocation13_spill] sm:$0xff]  ;;  %v6155_v40 = vld [vmem:[#allocation15_spill] sm:$0xff] }
 0x143   : > { %6147 = vst [vmem:[#allocation11_spill] sm:$0xff] %v5295_v6  ;;  %v5319_v7 = vmul.f32 %v5254_v22, %v6149_v21  ;;  %v5321_v1 = vmax.f32 %v1624_v56, 0.0  ;;  %v6153_v52 = vpack.c.bf16 %v4945_v57, %v4939_v11  ;;  %v5329_v51 = vmul.f32 %v5297_v60, %v6154_v33  ;;  %v6157_v57 = vld [vmem:[#allocation18_spill] sm:$0xff] }
 0x144   : > { %6148 = vst [vmem:[#allocation14_spill] sm:$0xff] %v5302_v26  ;;  %6150 = vst [vmem:[#allocation16_spill] sm:$0xff] %v5306_v31  ;;  %3787 = vmatpush3.bf16.msra.mxu0 %v6151_v42  ;;  %v5333_v42 = vmul.f32 %v5297_v60, %v6155_v40  ;;  %v5337_v21 = vmul.f32 %v5297_v60, %v6156_v32  ;;  %v5344_v56 = vmul.f32 %v5297_v60, %v6157_v57  ;;  %v6162_v31 = vld [vmem:[#allocation20_spill] sm:$0xff]  ;;  %v6168_v26 = vld [vmem:[#allocation25_spill] sm:$0xff] }
 0x145   : > { %6152 = vst [vmem:[#allocation19_spill] sm:$0xff] %v5319_v7  ;;  %3807 = vmatpush3.bf16.msra.mxu1 %v6153_v52  ;;  %3788 = vmatprep.subr.bf16.mxu0 %v6112_v45  ;;  %v5350_v19 = vmul.f32 %v5297_v60, %v6158_v15  ;;  %v5354_v37 = vmul.f32 %v5321_v1, %v6154_v33  ;;  %v6165_v7 = vld [vmem:[#allocation24_spill] sm:$0xff] }
 0x146   : > { %3808 = vmatprep.subr.bf16.mxu1 %v6112_v45  ;;  %v5358_v6 = vmul.f32 %v5321_v1, %v6155_v40  ;;  %v5362_v11 = vmul.f32 %v5321_v1, %v6156_v32  ;;  %v5366_v41 = vmul.f32 %v5321_v1, %v6157_v57  ;;  %v6160_v52 = vpack.c.bf16 %v4953_v20, %v4949_v10  ;;  %v6167_v20 = vld [vmem:[#allocation21_spill] sm:$0xff] }
 0x147   : > { %6159 = vst [vmem:[#allocation13_spill] sm:$0xff] %v5350_v19  ;;  %v5373_v33 = vmul.f32 %v5321_v1, %v6158_v15  ;;  %v5377_v40 = vmul.f32 %v5246_v61, %v6162_v31  ;;  %v5381_v32 = vmul.f32 %v5254_v22, %v6162_v31  ;;  %v5385_v57 = vmul.f32 %v5297_v60, %v6165_v7  ;;  %v6171_v19 = vld [vmem:[#allocation26_spill] sm:$0xff] }
 0x148   : > { %3789 = vmatpush3.bf16.msra.mxu0 %v6160_v52  ;;  %v6166_v10 = vpack.c.bf16 %v4966_v13, %v4962_v9  ;;  %v5410_v15 = vmul.f32 %v5246_v61, %v6167_v20  ;;  %v5414_v31 = vmul.f32 %v5254_v22, %v6167_v20  ;;  %v5418_v52 = vmul.f32 %v5297_v60, %v6168_v26 }
 0x149   : > { %6161 = vst [vmem:[#allocation15_spill] sm:$0xff] %v5373_v33  ;;  %6163 = vst [vmem:[#allocation17_spill] sm:$0xff] %v5377_v40  ;;  %3790 = vmatprep.subr.bf16.mxu0 %v6112_v45  ;;  %v5422_v9 = vmul.f32 %v5321_v1, %v6168_v26  ;;  %v6170_v40 = vld [vmem:[#allocation22_spill] sm:$0xff]  ;;  %v5439_v33 = vmul.f32 %v5297_v60, %v6171_v19  ;;  %v6172_v26 = vpack.c.bf16 %v4994_v44, %v4990_v62 }
 0x14a   : > { %6164 = vst [vmem:[#allocation18_spill] sm:$0xff] %v5381_v32  ;;  %3809 = vmatpush3.bf16.msra.mxu1 %v6166_v10  ;;  %v5406_v10 = vmul.f32 %v5321_v1, %v6165_v7  ;;  %v6169_v7 = vpack.c.bf16 %v4982_v47, %v4970_v17  ;;  %v5431_v32 = vmul.f32 %v5246_v61, %v6170_v40 }
 0x14b   : > { %3810 = vmatprep.subr.bf16.mxu1 %v6112_v45  ;;  %v5435_v20 = vmul.f32 %v5254_v22, %v6170_v40  ;;  %v1827_v17 = vpack.c.bf16 %v5414_v31, %v5410_v15  ;;  %v1835_v47 = vpack.c.bf16 %v5422_v9, %v5418_v52  ;;  %v5451_v61 = vmul.f32 %v5321_v1, %v6171_v19 }
 0x14c   : > { %3791 = vmatpush3.bf16.msra.mxu0 %v6169_v7  ;;  %v1834_v13 = vpack.c.bf16 %v5406_v10, %v5385_v57  ;;  %v6173_v44 = vpack.c.bf16 %v5004_v12, %v5000_v0  ;;  %v6174_v40 = vpack.c.bf16 %v5020_v63, %v5008_v25  ;;  %v6175_v19 = vpack.c.bf16 %v5063_v39, %v5038_v55  ;;  %v6182_v39 = vld [vmem:[#allocation4_spill] sm:$0xff] }
 0x14d   : > { %3792 = vmatprep.subr.bf16.mxu0 %v6112_v45  ;;  %v1828_v22 = vpack.c.bf16 %v5435_v20, %v5431_v32  ;;  %v1836_v62 = vpack.c.bf16 %v5451_v61, %v5439_v33  ;;  %v6176_v0 = vpack.c.bf16 %v5099_v29, %v5080_v35  ;;  %v6177_v25 = vpack.c.bf16 %v5067_v8, %v5050_v4  ;;  %v6181_v4 = vld [vmem:[#allocation27_spill] sm:$0xff]  ;;  %v6188_v29 = vld [vmem:[#allocation8_spill] sm:$0xff] }
 0x14e   : > { %3811 = vmatpush3.bf16.msra.mxu1 %v6172_v26  ;;  %v6178_v12 = vpack.c.bf16 %v5103_v5, %v5084_v16  ;;  %v6179_v63 = vpack.c.bf16 %v5071_v53, %v5054_v50  ;;  %v6180_v55 = vpack.c.bf16 %v5117_v24, %v5107_v34  ;;  %v6183_v8 = vpack.c.bf16 %v6181_v4, %v6182_v39  ;;  %v6185_v50 = vld [vmem:[#allocation6_spill] sm:$0xff]  ;;  %v6186_v53 = vld [vmem:[#allocation5_spill] sm:$0xff]  ;;  %v6190_v34 = vld [vmem:[#allocation28_spill] sm:$0xff] }
 0x14f   : > { %3812 = vmatprep.subr.bf16.mxu1 %v6112_v45  ;;  %v6184_v35 = vpack.c.bf16 %v5146_v3, %v5136_v49  ;;  %v6187_v16 = vpack.c.bf16 %v6185_v50, %v6186_v53  ;;  %v6189_v5 = vpack.c.bf16 %v5171_v2, %v6188_v29  ;;  %v6191_v24 = vld [vmem:[#allocation7_spill] sm:$0xff]  ;;  %v6193_v3 = vld [vmem:[#allocation9_spill] sm:$0xff]  ;;  %v6195_v2 = vpack.c.bf16 %v5206_v43, %v5202_v30  ;;  %v6207_v39 = vld [vmem:[#allocation14_spill] sm:$0xff] }
 0x150   : > { %3793 = vmatpush3.bf16.msra.mxu0 %v6173_v44  ;;  %v6192_v49 = vpack.c.bf16 %v6190_v34, %v6191_v24  ;;  %v6194_v7 = vpack.c.bf16 %v5193_v28, %v6193_v3  ;;  %v6196_v26 = vpack.c.bf16 %v5216_v18, %v5212_v48  ;;  %v6197_v28 = vpack.c.bf16 %v5230_v38, %v5226_v36  ;;  %v4032_v38 = vld [vmem:[%s4164_s23] sm:$0xff]  ;;  %v4033_v30 = vld [vmem:[%s4164_s23 + $0x8] sm:$0xff] }
 0x151   : > { %3818 = vmatprep.subr.bf16.mxu0 %v6112_v45  ;;  %v6198_v44 = vpack.c.bf16 %v5244_v54, %v5240_v23  ;;  %v6199_v48 = vpack.c.bf16 %v5287_v14, %v5263_v27  ;;  %v6200_v43 = vpack.c.bf16 %v5354_v37, %v5329_v51  ;;  %v452_v18 = vpack.c.bf16 %v4032_v38, %v4032_v38  ;;  %v4034_v54 = vld [vmem:[%s4164_s23 + $0x10] sm:$0xff]  ;;  %v4037_v53 = vld [vmem:[%s4164_s23 + $0x28] sm:$0xff]  ;;  %v4021_v32 = vld [vmem:[%s6010_s5] sm:$0xff]  }
 0x152   : > { %3813 = vmatpush3.bf16.msra.mxu1 %v6174_v40  ;;  %v453_v36 = vpack.c.bf16 %v4033_v30, %v4033_v30  ;;  %v6201_v23 = vpack.c.bf16 %v5291_v58, %v5267_v46  ;;  %v454_v27 = vpack.c.bf16 %v4034_v54, %v4034_v54  ;;  %v6202_v37 = vpack.c.bf16 %v5358_v6, %v5333_v42  ;;  %v4035_v40 = vld [vmem:[%s4164_s23 + $0x18] sm:$0xff] }
 0x153   : > { %3838 = vmatprep.subr.bf16.mxu1 %v6112_v45  ;;  %3795 = vmatmul.mubr.bf16.vlgmr.msra.gmra.mrb[20].mxu0 %v5046_v59  ;;  %v5560_v14 = vunpack.c.l.b16 %v452_v18  ;;  %v6204_v46 = vld [vmem:[#allocation10_spill] sm:$0xff]  ;;  %v6206_v6 = vpack.c.bf16 %v5362_v11, %v5337_v21  ;;  %v6210_v50 = vpack.c.bf16 %v5366_v41, %v5344_v56  ;;  %v6211_v56 = vld [vmem:[#allocation19_spill] sm:$0xff] }
 0x154   : > { %3819 = vmatpush3.bf16.msra.mxu0 %v6175_v19  ;;  %3834 = vmatprep.mubr.msk.bf16.mxu0 %vm4050_vm0, %v6112_v45  ;;  %v5562_v51 = vunpack.c.l.b16 %v453_v36  ;;  %v455_v19 = vpack.c.bf16 %v4035_v40, %v4035_v40 }
 0x155   : > { %3815 = vmatmul.mubr.bf16.vlgmr.msra.gmra.mrb[20].mxu1 %v5046_v59  ;;  %3820 = vmatprep.subr.bf16.mxu0 %v6112_v45  ;;  %v2317_v42 = vrot.slane %v5560_v14, 1  ;;  %v2455_v18 = vrot.slane %v5560_v14, 2 }
 0x156   : > { %3839 = vmatpush3.bf16.msra.mxu1 %v6176_v0  ;;  %3854 = vmatprep.mubr.msk.bf16.mxu1 %vm4050_vm0, %v6112_v45  ;;  %v6203_v0 = vld [vmem:[#allocation11_spill] sm:$0xff]  ;;  %v5579_v4 = vunpack.c.l.b16 %v455_v19  ;;  %v2456_v30 = vrot.slane %v5562_v51, 1  ;;  %v2524_v40 = vrot.slane %v5562_v51, 2  ;;  %v6217_v19 = vld [vmem:[#allocation18_spill] sm:$0xff]  ;;  %v2592_v52 = vrot.slane %v5562_v51, 3 }
 0x157   : > { %3840 = vmatprep.subr.bf16.mxu1 %v6112_v45  ;;  %v6205_v58 = vpack.c.bf16 %v6203_v0, %v6204_v46  ;;  %v2319_v29 = vsel %vm2318_vm3, %v5562_v51, %v2317_v42  ;;  %v6218_v0 = vld [vmem:[#allocation17_spill] sm:$0xff] }
 0x158   : > { %3821 = vmatpush3.bf16.msra.mxu0 %v6177_v25  ;;  %v5569_v25 = vunpack.c.l.b16 %v454_v27  ;;  %v2323_v24 = vrot.slane %v5579_v4, 6  ;;  %v2392_v41 = vrot.slane %v5579_v4, 5  ;;  %v6219_v46 = vpack.c.bf16 %v6217_v19, %v6218_v0 }
 0x159   : > { %3822 = vmatprep.subr.bf16.mxu0 %v6112_v45  ;;  %v2459_v57 = vrot.slane %v5579_v4, 7  ;;  %v2795_v0 = vrot.slane %v5560_v14, 7 }
 0x15a   : > { %3841 = vmatpush3.bf16.msra.mxu1 %v6178_v12  ;;  %v2388_v12 = vrot.slane %v5562_v51, 7  ;;  %v2320_v21 = vrot.slane %v5569_v25, 7  ;;  %v2390_v11 = vrot.slane %v5569_v25, 6 }
 0x15b   : > { %3842 = vmatprep.subr.bf16.mxu1 %v6112_v45 }
 0x15c   : > { %3823 = vmatpush3.bf16.msra.mxu0 %v6179_v63  ;;  %v4036_v63 = vld [vmem:[%s4164_s23 + $0x20] sm:$0xff] }
 0x15d   : > { %3824 = vmatprep.subr.bf16.mxu0 %v6112_v45 }
 0x15e   : > { %3843 = vmatpush3.bf16.msra.mxu1 %v6180_v55  ;;  %v456_v55 = vpack.c.bf16 %v4036_v63, %v4036_v63 }
 0x15f   : > { %3844 = vmatprep.subr.bf16.mxu1 %v6112_v45 }
 0x160   : > { %3825 = vmatpush3.bf16.msra.mxu0 %v6183_v8  ;;  %v6208_v8 = vld [vmem:[#allocation12_spill] sm:$0xff]  ;;  %v5596_v34 = vunpack.c.l.b16 %v456_v55  ;;  %v2457_v55 = vsel %vm2318_vm3, %v2456_v30, %v2455_v18 }
 0x161   : > { %3826 = vmatprep.subr.bf16.mxu0 %v6112_v45 }
 0x162   : > { %3845 = vmatpush3.bf16.msra.mxu1 %v6184_v35  ;;  %v6209_v35 = vpack.c.bf16 %v6207_v39, %v6208_v8  ;;  %v2326_v36 = vrot.slane %v5596_v34, 5  ;;  %v2461_v31 = vrot.slane %v5596_v34, 6 }
 0x163   : > { %3846 = vmatprep.subr.bf16.mxu1 %v6112_v45 }
 0x164   : > { %3827 = vmatpush3.bf16.msra.mxu0 %v6187_v16  ;;  %v457_v16 = vpack.c.bf16 %v4037_v53, %v4037_v53 }
 0x165   : > { %3828 = vmatprep.subr.bf16.mxu0 %v6112_v45 }
 0x166   : > { %3847 = vmatpush3.bf16.msra.mxu1 %v6189_v5  ;;  %v2389_v5 = vsel %vm2318_vm3, %v2388_v12, %v5560_v14  ;;  %v5610_v38 = vunpack.c.l.b16 %v457_v16  ;;  %v2591_v16 = vrot.slane %v5560_v14, 4 }
 0x167   : > { %3848 = vmatprep.subr.bf16.mxu1 %v6112_v45 }
 0x168   : > { %3829 = vmatpush3.bf16.msra.mxu0 %v6192_v49  ;;  %v6212_v49 = vld [vmem:[#allocation16_spill] sm:$0xff]  ;;  %v2329_v12 = vrot.slane %v5610_v38, 4  ;;  %v2396_v63 = vrot.slane %v5610_v38, 3  ;;  %v2593_v61 = vsel %vm2318_vm3, %v2592_v52, %v2591_v16 }
 0x169   : > { %3830 = vmatprep.subr.bf16.mxu0 %v6112_v45  ;;  %v6213_v3 = vpack.c.bf16 %v6211_v56, %v6212_v49  ;;  %v2529_v49 = vrot.slane %v5596_v34, 7 }
 0x16a   : > { %3849 = vmatpush3.bf16.msra.mxu1 %v6194_v7  ;;  %v4038_v7 = vld [vmem:[%s4164_s23 + $0x30] sm:$0xff] }
 0x16b   : > { %3850 = vmatprep.subr.bf16.mxu1 %v6112_v45 }
 0x16c   : > { %3831 = vmatpush3.bf16.msra.mxu0 %v6195_v2  ;;  %v458_v2 = vpack.c.bf16 %v4038_v7, %v4038_v7  ;;  %v2594_v7 = vrot.slane %v5569_v25, 2 }
 0x16d   : > { %3832 = vmatprep.subr.bf16.mxu0 %v6112_v45 }
 0x16e   : > { %3851 = vmatpush3.bf16.msra.mxu1 %v6196_v26  ;;  %v2322_v26 = vsel %vm2321_vm4, %v2320_v21, %v2319_v29  ;;  %v5625_v42 = vunpack.c.l.b16 %v458_v2  ;;  %v2660_v29 = vrot.slane %v5562_v51, 4  ;;  %v2531_v2 = vrot.slane %v5610_v38, 6 }
 0x16f   : > { %3852 = vmatprep.subr.bf16.mxu1 %v6112_v45  ;;  %v2325_v54 = vsel %vm2324_vm5, %v2323_v24, %v2322_v26 }
 0x170   : > { %3833 = vmatpush3.bf16.msra.mxu0 %v6197_v28  ;;  %v2391_v28 = vsel %vm2321_vm4, %v2390_v11, %v2389_v5  ;;  %v2328_v39 = vsel %vm2327_vm6, %v2326_v36, %v2325_v54  ;;  %v2332_v21 = vrot.slane %v5625_v42, 3  ;;  %v2458_v11 = vsel %vm2321_vm4, %v5569_v25, %v2457_v55  ;;  %v4020_v5 = vld [vmem:[%s6010_s5 + $0x8] sm:$0xff]  }
 0x171   : > { %3858 = vmatprep.subr.bf16.mxu0 %v6112_v45  ;;  %v2393_v27 = vsel %vm2324_vm5, %v2392_v41, %v2391_v28  ;;  %v2398_v15 = vrot.slane %v5625_v42, 2  ;;  %v2460_v9 = vsel %vm2324_vm5, %v2459_v57, %v2458_v11  ;;  %v2465_v30 = vrot.slane %v5625_v42, 4 }
 0x172   : > { %3853 = vmatpush3.bf16.msra.mxu1 %v6198_v44  ;;  %v6214_v44 = vld [vmem:[#allocation15_spill] sm:$0xff]  ;;  %v2462_v33 = vsel %vm2327_vm6, %v2461_v31, %v2460_v9  ;;  %v2595_v36 = vsel %vm2321_vm4, %v2594_v7, %v2593_v61  ;;  %v2666_v55 = vrot.slane %v5596_v34, 1  ;;  %v2798_v11 = vrot.slane %v5569_v25, 5 }
 0x173   : > { %3878 = vmatprep.subr.bf16.mxu1 %v6112_v45  ;;  %3835 = vmatmul.mubr.bf16.vlgmr.msra.gmra.mrb[24].mxu0 %v5046_v59  ;;  %v2601_v16 = vrot.slane %v5625_v42, 6  ;;  %v2800_v9 = vrot.slane %v5579_v4, 4 }
 0x174   : > { %3859 = vmatpush3.bf16.msra.mxu0 %v6199_v48  ;;  %3874 = vmatprep.mubr.msk.bf16.mxu0 %vm4050_vm0, %v6112_v45  ;;  %v6215_v48 = vld [vmem:[#allocation13_spill] sm:$0xff] }
 0x175   : > { %3855 = vmatmul.mubr.bf16.vlgmr.msra.gmra.mrb[24].mxu1 %v5046_v59  ;;  %3860 = vmatprep.subr.bf16.mxu0 %v6112_v45 }
 0x176   : > { %3879 = vmatpush3.bf16.msra.mxu1 %v6200_v43  ;;  %3894 = vmatprep.mubr.msk.bf16.mxu1 %vm4050_vm0, %v6112_v45  ;;  %v6216_v43 = vpack.c.bf16 %v6214_v44, %v6215_v48 }
 0x177   : > { %3880 = vmatprep.subr.bf16.mxu1 %v6112_v45 }
 0x178   : > { %3861 = vmatpush3.bf16.msra.mxu0 %v6201_v23  ;;  %v2394_v23 = vrot.slane %v5596_v34, 4 }
 0x179   : > { %3862 = vmatprep.subr.bf16.mxu0 %v6112_v45 }
 0x17a   : > { %3881 = vmatpush3.bf16.msra.mxu1 %v6202_v37  ;;  %v2523_v37 = vrot.slane %v5560_v14, 3  ;;  %v2395_v8 = vsel %vm2327_vm6, %v2394_v23, %v2393_v27  ;;  %v2533_v23 = vrot.slane %v5625_v42, 5  ;;  %v2727_v27 = vrot.slane %v5560_v14, 6 }
 0x17b   : > { %3882 = vmatprep.subr.bf16.mxu1 %v6112_v45  ;;  %v2397_v53 = vsel %vm2330_vm7, %v2396_v63, %v2395_v8 }
 0x17c   : > { %3863 = vmatpush3.bf16.msra.mxu0 %v6205_v58  ;;  %v4039_v58 = vld [vmem:[%s4164_s23 + $0x38] sm:$0xff]  ;;  %v2399_v20 = vsel %vm2333_vm8, %v2398_v15, %v2397_v53 }
 0x17d   : > { %3864 = vmatprep.subr.bf16.mxu0 %v6112_v45 }
 0x17e   : > { %3883 = vmatpush3.bf16.msra.mxu1 %v6206_v6  ;;  %v459_v6 = vpack.c.bf16 %v4039_v58, %v4039_v58 }
 0x17f   : > { %3884 = vmatprep.subr.bf16.mxu1 %v6112_v45 }
 0x180   : > { %3865 = vmatpush3.bf16.msra.mxu0 %v6209_v35  ;;  %v2526_v35 = vrot.slane %v5569_v25, 1  ;;  %v5643_v10 = vunpack.c.l.b16 %v459_v6  ;;  %v4022_v6 = vld [vmem:[%s6010_s5 + $0x10] sm:$0xff]  }
 0x181   : > { %3866 = vmatprep.subr.bf16.mxu0 %v6112_v45 }
 0x182   : > { %3885 = vmatpush3.bf16.msra.mxu1 %v6210_v50  ;;  %v2331_v50 = vsel %vm2330_vm7, %v2329_v12, %v2328_v39  ;;  %v2335_v41 = vrot.slane %v5643_v10, 2  ;;  %v2400_v56 = vrot.slane %v5643_v10, 1  ;;  %v2467_v12 = vrot.slane %v5643_v10, 3  ;;  %v4023_v39 = vld [vmem:[%s6010_s5 + $0x18] sm:$0xff]  }
 0x183   : > { %3886 = vmatprep.subr.bf16.mxu1 %v6112_v45  ;;  %v2334_v24 = vsel %vm2333_vm8, %v2332_v21, %v2331_v50 }
 0x184   : > { %3867 = vmatpush3.bf16.msra.mxu0 %v6213_v3  ;;  %v2337_v28 = vsel %vm2336_vm9, %v2335_v41, %v2334_v24  ;;  %v2401_v44 = vsel %vm2336_vm9, %v2400_v56, %v2399_v20  ;;  %v2734_v56 = vrot.slane %v5596_v34, 2 }
 0x185   : > { %3868 = vmatprep.subr.bf16.mxu0 %v6112_v45  ;;  %v2402_v58 = vpack.c.b16 %v2401_v44, %v2401_v44 }
 0x186   : > { %3887 = vmatpush3.bf16.msra.mxu1 %v6216_v43  ;;  %v2596_v43 = vrot.slane %v5579_v4, 1 }
 0x187   : > { %3888 = vmatprep.subr.bf16.mxu1 %v6112_v45 }
 0x188   : > { %3869 = vmatpush3.bf16.msra.mxu0 %v6219_v46  ;;  %v2796_v46 = vrot.slane %v5562_v51, 6  ;;  %v2597_v63 = vsel %vm2324_vm5, %v2596_v43, %v2595_v36  ;;  %v2806_v43 = vrot.slane %v5625_v42, 1 }
 0x189   : > { %3870 = vmatprep.subr.bf16.mxu0 %v6112_v45  ;;  %v2598_v50 = vsel %vm2327_vm6, %v5596_v34, %v2597_v63 }
 0x18a   : > { %3889 = vmatpush3.bf16.msra.mxu1 %v1834_v13  ;;  %v2525_v13 = vsel %vm2318_vm3, %v2524_v40, %v2523_v37  ;;  %v2728_v37 = vrot.slane %v5562_v51, 5  ;;  %v2338_v40 = vpack.c.b16 %v2337_v28, %v2337_v28  ;;  %v2797_v53 = vsel %vm2318_vm3, %v2796_v46, %v2795_v0  ;;  %v5811_v46 = vpop.permute.xlu1 %1841 }
 0x18b   : > { %3890 = vmatprep.subr.bf16.mxu1 %v6112_v45 }
 0x18c   : > { %3871 = vmatpush3.bf16.msra.mxu0 %v1827_v17  ;;  %v2527_v17 = vsel %vm2321_vm4, %v2526_v35, %v2525_v13  ;;  %v2730_v35 = vrot.slane %v5569_v25, 4  ;;  %v2599_v13 = vrot.slane %v5610_v38, 7  ;;  %v2729_v21 = vsel %vm2318_vm3, %v2728_v37, %v2727_v27 }
 0x18d   : > { %3872 = vmatprep.subr.bf16.mxu0 %v6112_v45  ;;  %v2528_v3 = vsel %vm2324_vm5, %v5579_v4, %v2527_v17  ;;  %v2732_v17 = vrot.slane %v5579_v4, 3 }
 0x18e   : > { %3891 = vmatpush3.bf16.msra.mxu1 %v1835_v47  ;;  %v2659_v47 = vrot.slane %v5560_v14, 5  ;;  %v2530_v48 = vsel %vm2327_vm6, %v2529_v49, %v2528_v3  ;;  %v2535_v14 = vrot.slane %v5643_v10, 4  ;;  %v2731_v52 = vsel %vm2321_vm4, %v2730_v35, %v2729_v21  ;;  %v4024_v49 = vld [vmem:[%s6010_s5 + $0x20] sm:$0xff]   ;;  %v4025_v3 = vld [vmem:[%s6010_s5 + $0x28] sm:$0xff]  }
 0x18f   : > { %3892 = vmatprep.subr.bf16.mxu1 %v6112_v45  ;;  %v2532_v19 = vsel %vm2330_vm7, %v2531_v2, %v2530_v48  ;;  %v2733_v20 = vsel %vm2324_vm5, %v2732_v17, %v2731_v52  ;;  %v2736_v2 = vrot.slane %v5610_v38, 1  ;;  %v4030_v52 = vld [vmem:[%s6012_s7 + $0x10] sm:$0xff]  }
 0x190   : > { %3873 = vmatpush3.bf16.msra.mxu0 %v1828_v22  ;;  %v2463_v22 = vrot.slane %v5610_v38, 5  ;;  %v2661_v26 = vsel %vm2318_vm3, %v2660_v29, %v2659_v47  ;;  %v2534_v57 = vsel %vm2333_vm8, %v2533_v23, %v2532_v19  ;;  %v2600_v47 = vsel %vm2330_vm7, %v2599_v13, %v2598_v50 }
 0x191   : > { %3898 = vmatprep.subr.bf16.mxu0 %v6112_v45  ;;  %v2669_v29 = vrot.slane %v5625_v42, 7  ;;  %v2602_v7 = vsel %vm2333_vm8, %v2601_v16, %v2600_v47  ;;  %v2739_v23 = vrot.slane %v5643_v10, 7  ;;  %v4029_v16 = vld [vmem:[%s6012_s7 + $0x8] sm:$0xff]   ;;  %v4031_v47 = vld [vmem:[%s6012_s7 + $0x18] sm:$0xff]  }
 0x192   : > { %3893 = vmatpush3.bf16.msra.mxu1 %v1836_v62  ;;  %v2662_v62 = vrot.slane %v5569_v25, 3  ;;  %v2464_v18 = vsel %vm2330_vm7, %v2463_v22, %v2462_v33  ;;  %v2536_v25 = vsel %vm2336_vm9, %v2535_v14, %v2534_v57  ;;  %v2802_v22 = vrot.slane %v5596_v34, 3 }
 0x193   : > { %3904 = vmatprep.subr.bf16.mxu1 %v6112_v45  ;;  %3875 = vmatmul.mubr.bf16.vlgmr.msra.gmra.mrb[28].mxu0 %v5046_v59  ;;  %v2466_v8 = vsel %vm2333_vm8, %v2465_v30, %v2464_v18  ;;  %v2671_v33 = vrot.slane %v5643_v10, 6  ;;  %v2804_v34 = vrot.slane %v5610_v38, 2 }
 0x194   : > { %3899 = vmatpush3.bf16.msra.mxu0 %v4020_v5  ;;  %3900 = vmatprep.mubr.msk.bf16.mxu0 %vm4050_vm0, %v6112_v45  ;;  %v2663_v54 = vsel %vm2321_vm4, %v2662_v62, %v2661_v26  ;;  %v2468_v15 = vsel %vm2336_vm9, %v2467_v12, %v2466_v8  ;;  %v2799_v5 = vsel %vm2321_vm4, %v2798_v11, %v2797_v53 }
 0x195   : > { %3895 = vmatmul.mubr.bf16.vlgmr.msra.gmra.mrb[28].mxu1 %v5046_v59  ;;  %v2664_v59 = vrot.slane %v5579_v4, 2  ;;  %3910 = vmatprep.subr.bf16.mxu0 %v6112_v45  ;;  %v2469_v24 = vpack.c.b16 %v2468_v15, %v2468_v15  ;;  %v2537_v4 = vpack.c.b16 %v2536_v25, %v2536_v25  ;;  %v2801_v61 = vsel %vm2324_vm5, %v2800_v9, %v2799_v5 }
 0x196   : > { %3905 = vmatpush3.bf16.msra.mxu1 %v4021_v32  ;;  %3906 = vmatprep.mubr.msk.bf16.mxu1 %vm4050_vm0, %v6112_v45  ;;  %v2603_v32 = vrot.slane %v5643_v10, 5  ;;  %v2735_v26 = vsel %vm2327_vm6, %v2734_v56, %v2733_v20  ;;  %v2803_v44 = vsel %vm2327_vm6, %v2802_v22, %v2801_v61 }
 0x197   : > { %3916 = vmatprep.subr.bf16.mxu1 %v6112_v45  ;;  %v2665_v51 = vsel %vm2324_vm5, %v2664_v59, %v2663_v54  ;;  %v2805_v30 = vsel %vm2330_vm7, %v2804_v34, %v2803_v44  ;;  %v4026_v59 = vld [vmem:[%s6010_s5 + $0x30] sm:$0xff]   ;;  %v4027_v54 = vld [vmem:[%s6010_s5 + $0x38] sm:$0xff]  }
 0x198   : > { %v2667_v31 = vsel %vm2327_vm6, %v2666_v55, %v2665_v51  ;;  %v2604_v28 = vsel %vm2336_vm9, %v2603_v32, %v2602_v7  ;;  %v2807_v37 = vsel %vm2333_vm8, %v2806_v43, %v2805_v30 }
 0x199   : > { %v2668_v41 = vsel %vm2330_vm7, %v5610_v38, %v2667_v31  ;;  %v2737_v38 = vsel %vm2330_vm7, %v2736_v2, %v2735_v26  ;;  %v2605_v18 = vpack.c.b16 %v2604_v28, %v2604_v28  ;;  %v2808_v19 = vsel %vm2336_vm9, %v5643_v10, %v2807_v37  ;;  %v4028_v10 = vld [vmem:[%s6012_s7] sm:$0xff]  }
 0x19a   : > { %v2670_v62 = vsel %vm2333_vm8, %v2669_v29, %v2668_v41  ;;  %v2738_v27 = vsel %vm2333_vm8, %v5625_v42, %v2737_v38  ;;  %v2809_v0 = vpack.c.b16 %v2808_v19, %v2808_v19 }
 0x19b   : > { %3901 = vmatmul.mubr.msk.bf16.vlgmr.msra.gmra.mrb[32].mxu0 %vm2199_vm2, %v2338_v40  ;;  %v2672_v48 = vsel %vm2336_vm9, %v2671_v33, %v2670_v62  ;;  %v2740_v40 = vsel %vm2336_vm9, %v2739_v23, %v2738_v27 }
 0x19c   : > { %3911 = vmatpush3.bf16.msra.mxu0 %v4022_v6  ;;  %3912 = vmatprep.mubr.msk.bf16.mxu0 %vm4050_vm0, %v6112_v45  ;;  %v2673_v36 = vpack.c.b16 %v2672_v48, %v2672_v48  ;;  %v2741_v42 = vpack.c.b16 %v2740_v40, %v2740_v40 }
 0x19d   : > { %3907 = vmatmul.mubr.msk.bf16.vlgmr.msra.gmra.mrb[32].mxu1 %vm2199_vm2, %v2402_v58  ;;  %3922 = vmatprep.subr.bf16.mxu0 %v6112_v45  ;;  %v5817_v58 = vpop.permute.xlu1 %1846 }
 0x19e   : > { %3917 = vmatpush3.bf16.msra.mxu1 %v4023_v39  ;;  %3918 = vmatprep.mubr.msk.bf16.mxu1 %vm4050_vm0, %v6112_v45 }
 0x19f   : > { %3928 = vmatprep.subr.bf16.mxu1 %v6112_v45 }
 0x1a3   : > { %3913 = vmatmul.mubr.msk.bf16.vlgmr.msra.gmra.mrb[36].mxu0 %vm2199_vm2, %v2469_v24 }
 0x1a4   : > { %3923 = vmatpush3.bf16.msra.mxu0 %v4024_v49  ;;  %3924 = vmatprep.mubr.msk.bf16.mxu0 %vm4050_vm0, %v6112_v45 }
 0x1a5   : > { %3919 = vmatmul.mubr.msk.bf16.vlgmr.msra.gmra.mrb[36].mxu1 %vm2199_vm2, %v2537_v4  ;;  %3934 = vmatprep.subr.bf16.mxu0 %v6112_v45 }
 0x1a6   : > { %3929 = vmatpush3.bf16.msra.mxu1 %v4025_v3  ;;  %3930 = vmatprep.mubr.msk.bf16.mxu1 %vm4050_vm0, %v6112_v45 }
 0x1a7   : > { %3940 = vmatprep.subr.bf16.mxu1 %v6112_v45 }
 0x1ab   : > { %3925 = vmatmul.mubr.msk.bf16.vlgmr.msra.gmra.mrb[40].mxu0 %vm2199_vm2, %v2605_v18 }
 0x1ac   : > { %3935 = vmatpush3.bf16.msra.mxu0 %v4026_v59  ;;  %3936 = vmatprep.mubr.msk.bf16.mxu0 %vm4050_vm0, %v6112_v45 }
 0x1ad   : > { %3931 = vmatmul.mubr.msk.bf16.vlgmr.msra.gmra.mrb[40].mxu1 %vm2199_vm2, %v2673_v36  ;;  %3946 = vmatprep.subr.bf16.mxu0 %v6112_v45 }
 0x1ae   : > { %3941 = vmatpush3.bf16.msra.mxu1 %v4027_v54  ;;  %3942 = vmatprep.mubr.msk.bf16.mxu1 %vm4050_vm0, %v6112_v45 }
 0x1b3   : > { %3937 = vmatmul.mubr.msk.bf16.vlgmr.msra.gmra.mrb[44].mxu0 %vm2199_vm2, %v2741_v42 }
 0x1b4   : > { %3954 = vmatprep.mubr.msk.bf16.mxu0 %vm4050_vm0, %v6112_v45  ;;  %3947 = vmatpush3.bf16.msra.mxu0 %v4028_v10 }
 0x1b5   : > { %3943 = vmatmul.mubr.msk.bf16.vlgmr.msra.gmra.mrb[44].mxu1 %vm2199_vm2, %v2809_v0  ;;  %3948 = vmatprep.subr.bf16.mxu0 %v6112_v45 }
 0x1b6   : > { %3962 = vmatprep.mubr.msk.f32.mxu1 %vm4050_vm0, %v6112_v45 }
 0x1b8   : > { %3949 = vmatpush3.bf16.msra.mxu0 %v4029_v16 }
 0x1b9   : > { %3950 = vmatprep.subr.bf16.mxu0 %v6112_v45 }
 0x1bc   : > { %3951 = vmatpush3.bf16.msra.mxu0 %v4030_v52 }
 0x1bd   : > { %3952 = vmatprep.subr.bf16.mxu0 %v6112_v45 }
 0x1c0   : > { %3953 = vmatpush3.bf16.msra.mxu0 %v4031_v47 }
 0x204   : > { %v1889_v6 = vpop.f32.mrb[16].mxu0 }
 0x205   : > { %v1890_v12 = vadd.f32 %v1889_v6, %v5811_v46  ;;  %v3756_v55 = vpop.f32.mrb[17].mxu0 }
 0x206   : > { %v1930_v63 = vpop.f32.mrb[16].mxu1  ;;  %v1892_v14 = vpop.f32.mrb[18].mxu0 }
 0x207   : > { %v1931_v39 = vadd.f32 %v1930_v63, %v5811_v46  ;;  %v3776_v8 = vpop.f32.mrb[17].mxu1  ;;  %v2183_v51 = vmax.f32 %v1890_v12, 0.0  ;;  %v1893_v35 = vadd.f32 %v1892_v14, %v5817_v58  ;;  %v3757_v13 = vpop.f32.mrb[19].mxu0 }
 0x208   : > { %v1933_v57 = vpop.f32.mrb[18].mxu1 }
 0x209   : > { %v2185_v21 = vmax.f32 %v1931_v39, 0.0  ;;  %v3777_v11 = vpop.f32.mrb[19].mxu1  ;;  %v2184_v50 = vmax.f32 %v1893_v35, 0.0  ;;  %v1934_v53 = vadd.f32 %v1933_v57, %v5817_v58  ;;  %v2248_v15 = vsel %vm2199_vm2, %v2183_v51, 0.0 }
 0x20a   : > { %2249 = vadd.xlane.f32.xlu0 %v2248_v15 }
 0x20b   : > { %v2251_v31 = vsel %vm2199_vm2, %v2184_v50, 0.0  ;;  %v2254_v17 = vsel %vm2199_vm2, %v2185_v21, 0.0  ;;  %v2186_v25 = vmax.f32 %v1934_v53, 0.0 }
 0x20c   : > { %2252 = vadd.xlane.f32.xlu1 %v2251_v31 }
 0x20d   : > { %v2257_v9 = vsel %vm2199_vm2, %v2186_v25, 0.0 }
 0x20e   : > { %2255 = vadd.xlane.f32.xlu0 %v2254_v17 }
 0x212   : > { %2258 = vadd.xlane.f32.xlu0 %v2257_v9 }
 0x226   : > { %v1971_v29 = vpop.f32.mrb[20].mxu0 }
 0x227   : > { %v1972_v5 = vadd.f32 %v1971_v29, %v5811_v46  ;;  %v3796_v41 = vpop.f32.mrb[21].mxu0 }
 0x228   : > { %v2012_v24 = vpop.f32.mrb[20].mxu1  ;;  %v1974_v49 = vpop.f32.mrb[22].mxu0 }
 0x229   : > { %v2013_v56 = vadd.f32 %v2012_v24, %v5811_v46  ;;  %v3816_v4 = vpop.f32.mrb[21].mxu1  ;;  %v2187_v32 = vmax.f32 %v1972_v5, 0.0  ;;  %v1975_v20 = vadd.f32 %v1974_v49, %v5817_v58  ;;  %v3797_v3 = vpop.f32.mrb[23].mxu0 }
 0x22a   : > { %v2015_v22 = vpop.f32.mrb[22].mxu1 }
 0x22b   : > { %v2189_v7 = vmax.f32 %v2013_v56, 0.0  ;;  %v2016_v33 = vadd.f32 %v2015_v22, %v5817_v58  ;;  %v3817_v61 = vpop.f32.mrb[23].mxu1  ;;  %v2188_v62 = vmax.f32 %v1975_v20, 0.0  ;;  %v2260_v2 = vsel %vm2199_vm2, %v2187_v32, 0.0 }
 0x22c   : > { %2261 = vadd.xlane.f32.xlu1 %v2260_v2  ;;  %v2242_v20 = vsel %vm2199_vm2, %v5297_v60, 0.0  ;;  %v2245_v22 = vsel %vm2199_vm2, %v5321_v1, 0.0 }
 0x22d   : > { %v2190_v26 = vmax.f32 %v2016_v33, 0.0  ;;  %v2263_v34 = vsel %vm2199_vm2, %v2188_v62, 0.0  ;;  %v2266_v28 = vsel %vm2199_vm2, %v2189_v7, 0.0 }
 0x22e   : > { %2264 = vadd.xlane.f32.xlu0 %v2263_v34 }
 0x22f   : > { %v2269_v44 = vsel %vm2199_vm2, %v2190_v26, 0.0 }
 0x230   : > { %2267 = vadd.xlane.f32.xlu1 %v2266_v28 }
 0x232   : > { %2270 = vadd.xlane.f32.xlu0 %v2269_v44 }
 0x246   : > { %v2053_v48 = vpop.f32.mrb[24].mxu0 }
 0x247   : > { %v2054_v38 = vadd.f32 %v2053_v48, %v5811_v46  ;;  %v3836_v18 = vpop.f32.mrb[25].mxu0 }
 0x248   : > { %v2094_v43 = vpop.f32.mrb[24].mxu1  ;;  %v2056_v59 = vpop.f32.mrb[26].mxu0 }
 0x249   : > { %v2095_v30 = vadd.f32 %v2094_v43, %v5811_v46  ;;  %v3856_v36 = vpop.f32.mrb[25].mxu1  ;;  %v2191_v23 = vmax.f32 %v2054_v38, 0.0  ;;  %v2057_v54 = vadd.f32 %v2056_v59, %v5817_v58  ;;  %v3837_v37 = vpop.f32.mrb[27].mxu0 }
 0x24a   : > { %v2097_v27 = vpop.f32.mrb[26].mxu1  ;;  %v4052_v37 = vmov 0.0|0.0  }
 0x24b   : > { %v2193_v40 = vmax.f32 %v2095_v30, 0.0  ;;  %v2098_v19 = vadd.f32 %v2097_v27, %v5817_v58  ;;  %v3857_v42 = vpop.f32.mrb[27].mxu1  ;;  %v2192_v0 = vmax.f32 %v2057_v54, 0.0  ;;  %v2272_v10 = vsel %vm2199_vm2, %v2191_v23, 0.0  ;;  %v2955_v54 = vld [vmem:[%s6015_s10] sm:$0xff]  ;;  %v2956_v27 = vld [vmem:[%s6015_s10 + $0x8] sm:$0xff]  ;;  %3983 = vmatprep.subr.bf16.mxu1 %v4052_v37 }
 0x24c   : > { %2273 = vadd.xlane.f32.xlu1 %v2272_v10 }
 0x24d   : > { %v2194_v6 = vmax.f32 %v2098_v19, 0.0  ;;  %v2275_v12 = vsel %vm2199_vm2, %v2192_v0, 0.0  ;;  %v2278_v63 = vsel %vm2199_vm2, %v2193_v40, 0.0  ;;  %v3984_v40 = vpack.c.bf16 %v2956_v27, %v2955_v54 }
 0x24e   : > { %2276 = vadd.xlane.f32.xlu0 %v2275_v12 }
 0x24f   : > { %v2281_v55 = vsel %vm2199_vm2, %v2194_v6, 0.0  ;;  %3985 = vmatpush3.bf16.msra.mxu1 %v3984_v40  ;;  %v3485_v6 = vld [vmem:[%s6011_s6] ss:$0 sm:$0xff] }
 0x250   : > { %2279 = vadd.xlane.f32.xlu1 %v2278_v63  ;;  %3986 = vmatprep.subr.bf16.mxu1 %v4052_v37 }
 0x252   : > { %2282 = vadd.xlane.f32.xlu0 %v2281_v55 }
 0x266   : > { %v2135_v39 = vpop.f32.mrb[28].mxu0 }
 0x267   : > { %v2136_v8 = vadd.f32 %v2135_v39, %v5811_v46  ;;  %v3876_v51 = vpop.f32.mrb[29].mxu0 }
 0x268   : > { %v2176_v14 = vpop.f32.mrb[28].mxu1  ;;  %v2138_v13 = vpop.f32.mrb[30].mxu0 }
 0x269   : > { %v2177_v35 = vadd.f32 %v2176_v14, %v5811_v46  ;;  %v3896_v57 = vpop.f32.mrb[29].mxu1  ;;  %v2195_v21 = vmax.f32 %v2136_v8, 0.0  ;;  %v2139_v11 = vadd.f32 %v2138_v13, %v5817_v58  ;;  %v3877_v53 = vpop.f32.mrb[31].mxu0 }
 0x26a   : > { %v2179_v50 = vpop.f32.mrb[30].mxu1  ;;  %v2205_v13 = vpop.xlane.xlu0 %2204 }
 0x26b   : > { %v2180_v15 = vadd.f32 %v2179_v50, %v5817_v58  ;;  %v3897_v31 = vpop.f32.mrb[31].mxu1  ;;  %v2197_v17 = vmax.f32 %v2177_v35, 0.0  ;;  %v2196_v25 = vmax.f32 %v2139_v11, 0.0  ;;  %v2284_v16 = vsel %vm2199_vm2, %v2195_v21, 0.0  ;;  %v2202_v11 = vpop.xlane.xlu1 %2201 }
 0x26c   : > { %2285 = vadd.xlane.f32.xlu1 %v2284_v16 }
 0x26d   : > { %v2198_v52 = vmax.f32 %v2180_v15, 0.0  ;;  %v2287_v9 = vsel %vm2199_vm2, %v2196_v25, 0.0  ;;  %v2290_v5 = vsel %vm2199_vm2, %v2197_v17, 0.0 }
 0x26e   : > { %2288 = vadd.xlane.f32.xlu0 %v2287_v9  ;;  %v2382_v46 = vpop.f32.mrb[32].mxu0  ;;  %v2211_v21 = vpop.xlane.xlu0 %2210 }
 0x26f   : > { %v3902_v29 = vpop.f32.mrb[33].mxu0  ;;  %v2293_v49 = vsel %vm2199_vm2, %v2198_v52, 0.0  ;;  %v2208_v53 = vpop.xlane.xlu1 %2207 }
 0x270   : > { %v2446_v47 = vpop.f32.mrb[32].mxu1  ;;  %2291 = vadd.xlane.f32.xlu1 %v2290_v5  ;;  %v2385_v56 = vpop.f32.mrb[34].mxu0 }
 0x271   : > { %v2447_v24 = vadd.f32 %v2446_v47, %v2382_v46  ;;  %v3908_v41 = vpop.f32.mrb[33].mxu1  ;;  %v3903_v4 = vpop.f32.mrb[35].mxu0 }
 0x272   : > { %v2449_v58 = vpop.f32.mrb[34].mxu1  ;;  %2294 = vadd.xlane.f32.xlu0 %v2293_v49  ;;  %v2217_v50 = vpop.xlane.xlu0 %2216  ;;  %v6220_v4 = vlaneseq }
 0x273   : > { %v3909_v32 = vpop.f32.mrb[35].mxu1  ;;  %v2214_v31 = vpop.xlane.xlu1 %2213 }
 0x274   : > { %2243 = vadd.xlane.f32.xlu1 %v2242_v20  ;;  %v2974_v49 = vand.u32 127, %v6220_v4 }
 0x276   : > { %2246 = vadd.xlane.f32.xlu0 %v2245_v22  ;;  %v2513_v3 = vpop.f32.mrb[36].mxu0  ;;  %v5878_v15 = vpop.xlane.xlu0 %2222  ;;  %v2979_v20 = vadd.s32 4294967288, %v2974_v49 }
 0x277   : > { %v2519_v7 = vadd.f32 %v2513_v3, %v2447_v24  ;;  %v3914_v61 = vpop.f32.mrb[37].mxu0  ;;  %v2220_v25 = vpop.xlane.xlu1 %2219 }
 0x278   : > { %v2581_v33 = vpop.f32.mrb[36].mxu1  ;;  %v2516_v2 = vpop.f32.mrb[38].mxu0 }
 0x279   : > { %v3920_v62 = vpop.f32.mrb[37].mxu1  ;;  %v2587_v26 = vadd.f32 %v2581_v33, %v2519_v7  ;;  %v3915_v28 = vpop.f32.mrb[39].mxu0  ;;  %v6221_v7 = vld [vmem:[#allocation3_spill] sm:$0xff] }
 0x27a   : > { %v2584_v34 = vpop.f32.mrb[38].mxu1  ;;  %v5880_v17 = vpop.xlane.xlu0 %2228  ;;  %v5894_v33 = vsub.s32 %v2979_v20, %v6221_v7  ;;  %v5897_v62 = vsub.s32 %v2974_v49, %v6221_v7 }
 0x27b   : > { %v3921_v44 = vpop.f32.mrb[39].mxu1  ;;  %v5884_v52 = vpop.xlane.xlu1 %2225 }
 0x27c   : > { %v3160_v2 = vrot.slane %v2211_v21, %v5894_v33  ;;  %v3156_v34 = vrot.slane %v2208_v53, %v5897_v62  ;;  %v3147_v44 = vrot.slane %v2202_v11, %v5897_v62  ;;  %v3165_v27 = vrot.slane %v2214_v31, %v5897_v62 }
 0x27d   : > { %v3187_v21 = vrot.slane %v5880_v17, %v5894_v33  ;;  %v2953_v17 = vld [vmem:[%s6014_s9] sm:$0xff] }
 0x27e   : > { %v2649_v48 = vpop.f32.mrb[40].mxu0  ;;  %v5882_v16 = vpop.xlane.xlu0 %2234 }
 0x27f   : > { %v2655_v38 = vadd.f32 %v2649_v48, %v2587_v26  ;;  %v3926_v18 = vpop.f32.mrb[41].mxu0  ;;  %v5888_v47 = vpop.xlane.xlu1 %2231  ;;  %v3151_v26 = vrot.slane %v2205_v13, %v5894_v33 }
 0x280   : > { %v2717_v43 = vpop.f32.mrb[40].mxu1  ;;  %v2652_v30 = vpop.f32.mrb[42].mxu0  ;;  %v3192_v49 = vrot.slane %v5888_v47, %v5897_v62 }
 0x281   : > { %v3932_v60 = vpop.f32.mrb[41].mxu1  ;;  %v2723_v36 = vadd.f32 %v2717_v43, %v2655_v38  ;;  %v3927_v1 = vpop.f32.mrb[43].mxu0  ;;  %v3161_v38 = vsel %vm2984_vm10, %v3160_v2, %v3156_v34  ;;  %v3169_v43 = vrot.slane %v2217_v50, %v5894_v33  ;;  %v3152_v54 = vsel %vm2984_vm10, %v3151_v26, %v3147_v44 }
 0x282   : > { %v2720_v59 = vpop.f32.mrb[42].mxu1  ;;  %v5886_v9 = vpop.xlane.xlu0 %2240 }
 0x283   : > { %v3933_v23 = vpop.f32.mrb[43].mxu1  ;;  %v5890_v29 = vpop.xlane.xlu1 %2237 }
 0x286   : > { %v2785_v19 = vpop.f32.mrb[44].mxu0 }
 0x287   : > { %v2791_v42 = vadd.f32 %v2785_v19, %v2723_v36  ;;  %v3938_v10 = vpop.f32.mrb[45].mxu0 }
 0x288   : > { %v2853_v0 = vpop.f32.mrb[44].mxu1  ;;  %v2788_v63 = vpop.f32.mrb[46].mxu0 }
 0x289   : > { %v3944_v12 = vpop.f32.mrb[45].mxu1  ;;  %v2859_v55 = vadd.f32 %v2853_v0, %v2791_v42  ;;  %v3939_v8 = vpop.f32.mrb[47].mxu0  ;;  %v3178_v0 = vrot.slane %v5878_v15, %v5894_v33  ;;  %v3216_v63 = vsel %vm2318_vm3, %v3161_v38, %v3152_v54 }
 0x28a   : > { %v2856_v39 = vpop.f32.mrb[46].mxu1 }
 0x28b   : > { %v3945_v14 = vpop.f32.mrb[47].mxu1  ;;  %v2867_v51 = vadd.f32 %v3485_v6, %v2859_v55  ;;  %v3170_v55 = vsel %vm2984_vm10, %v3169_v43, %v3165_v27  ;;  %v3174_v39 = vrot.slane %v2220_v25, %v5897_v62  ;;  %v3196_v25 = vrot.slane %v5882_v16, %v5894_v33 }
 0x28c   : > { %v3217_v2 = vsel %vm2321_vm4, %v3170_v55, %v3216_v63 }
 0x28d   : > { %v2868_v35 = vmax.f32 %v2867_v51, 0.0  ;;  %v3179_v31 = vsel %vm2984_vm10, %v3178_v0, %v3174_v39  ;;  %v3197_v26 = vsel %vm2984_vm10, %v3196_v25, %v3192_v49 }
 0x28e   : > { %v3218_v44 = vsel %vm2324_vm5, %v3179_v31, %v3217_v2 }
 0x28f   : > { %v2869_v57 = vpack.c.bf16 %v2868_v35, %v2868_v35 }
 0x291   : > { %3955 = vmatmul.mubr.msk.bf16.vlgmr.msra.gmra.mrb[48].mxu0 %vm1295_vm1, %v2869_v57 }
 0x297   : > { %v2250_v46 = vpop.xlane.xlu0 %2249 }
 0x298   : > { %v2978_v36 = vrot.slane %v2250_v46, %v5897_v62 }
 0x299   : > { %v2253_v24 = vpop.xlane.xlu1 %2252 }
 0x29a   : > { %v2983_v59 = vrot.slane %v2253_v24, %v5894_v33  ;;  %v2954_v24 = vld [vmem:[%s6014_s9 + $0x8] sm:$0xff] }
 0x29b   : > { %v2256_v5 = vpop.xlane.xlu0 %2255 }
 0x29c   : > { %v2989_v1 = vrot.slane %v2256_v5, %v5897_v62  ;;  %v2985_v51 = vsel %vm2984_vm10, %v2983_v59, %v2978_v36 }
 0x29f   : > { %v2259_v41 = vpop.xlane.xlu0 %2258 }
 0x2a0   : > { %v2993_v48 = vrot.slane %v2259_v41, %v5894_v33  ;;  %v3183_v41 = vrot.slane %v5884_v52, %v5897_v62  ;;  %v3201_v52 = vrot.slane %v5890_v29, %v5897_v62  ;;  %v3296_v29 = vld [vmem:[%s6016_s11 + $0x8] sm:$0xff] }
 0x2a2   : > { %v2994_v10 = vsel %vm2984_vm10, %v2993_v48, %v2989_v1 }
 0x2a3   : > { %v3049_v11 = vsel %vm2318_vm3, %v2994_v10, %v2985_v51 }
 0x2b9   : > { %v2262_v56 = vpop.xlane.xlu1 %2261 }
 0x2ba   : > { %v2998_v18 = vrot.slane %v2262_v56, %v5897_v62  ;;  %v3205_v56 = vrot.slane %v5886_v9, %v5894_v33 }
 0x2bb   : > { %v2265_v58 = vpop.xlane.xlu0 %2264 }
 0x2bc   : > { %v3002_v60 = vrot.slane %v2265_v58, %v5894_v33  ;;  %v3206_v48 = vsel %vm2984_vm10, %v3205_v56, %v3201_v52 }
 0x2bd   : > { %v2268_v32 = vpop.xlane.xlu1 %2267 }
 0x2be   : > { %v3007_v6 = vrot.slane %v2268_v32, %v5897_v62  ;;  %v3003_v8 = vsel %vm2984_vm10, %v3002_v60, %v2998_v18 }
 0x2bf   : > { %v2271_v22 = vpop.xlane.xlu0 %2270  ;;  %v3050_v46 = vsel %vm2321_vm4, %v3003_v8, %v3049_v11 }
 0x2c0   : > { %v3011_v23 = vrot.slane %v2271_v22, %v5894_v33 }
 0x2c2   : > { %v3012_v35 = vsel %vm2984_vm10, %v3011_v23, %v3007_v6 }
 0x2c3   : > { %v3051_v16 = vsel %vm2324_vm5, %v3012_v35, %v3050_v46 }
 0x2d9   : > { %v2274_v3 = vpop.xlane.xlu1 %2273 }
 0x2da   : > { %v3016_v40 = vrot.slane %v2274_v3, %v5897_v62  ;;  %v3188_v3 = vsel %vm2984_vm10, %v3187_v21, %v3183_v41 }
 0x2db   : > { %v2277_v61 = vpop.xlane.xlu0 %2276  ;;  %v3219_v18 = vsel %vm2327_vm6, %v3188_v3, %v3218_v44 }
 0x2dc   : > { %v3020_v19 = vrot.slane %v2277_v61, %v5894_v33  ;;  %v3987_v61 = vpack.c.bf16 %v2954_v24, %v2953_v17  ;;  %v3220_v36 = vsel %vm2330_vm7, %v3197_v26, %v3219_v18 }
 0x2dd   : > { %v2280_v28 = vpop.xlane.xlu1 %2279  ;;  %v3221_v1 = vsel %vm2333_vm8, %v3206_v48, %v3220_v36 }
 0x2de   : > { %v3025_v57 = vrot.slane %v2280_v28, %v5897_v62  ;;  %v3021_v50 = vsel %vm2984_vm10, %v3020_v19, %v3016_v40  ;;  %v3295_v28 = vld [vmem:[%s6016_s11] sm:$0xff] }
 0x2df   : > { %v2283_v30 = vpop.xlane.xlu0 %2282  ;;  %v3052_v32 = vsel %vm2327_vm6, %v3021_v50, %v3051_v16  ;;  %v3990_v59 = vpack.c.bf16 %v3296_v29, %v3295_v28  ;;  %v3486_v40 = vld [vmem:[%s6013_s8] ss:$0 sm:$0xff] }
 0x2e0   : > { %v3029_v12 = vrot.slane %v2283_v30, %v5894_v33 }
 0x2e2   : > { %v3030_v5 = vsel %vm2984_vm10, %v3029_v12, %v3025_v57 }
 0x2e3   : > { %v3053_v9 = vsel %vm2330_vm7, %v3030_v5, %v3052_v32 }
 0x2f9   : > { %v2286_v42 = vpop.xlane.xlu1 %2285 }
 0x2fa   : > { %v3034_v53 = vrot.slane %v2286_v42, %v5897_v62 }
 0x2fb   : > { %v2289_v14 = vpop.xlane.xlu0 %2288 }
 0x2fc   : > { %v3038_v13 = vrot.slane %v2289_v14, %v5894_v33  ;;  %v3495_v14 = vld [vmem:[#allocation2] ss:$0 sm:$0xff] }
 0x2fd   : > { %v2292_v15 = vpop.xlane.xlu1 %2291 }
 0x2fe   : > { %v3039_v58 = vsel %vm2984_vm10, %v3038_v13, %v3034_v53  ;;  %v3043_v20 = vrot.slane %v2292_v15, %v5897_v62 }
 0x2ff   : > { %v2295_v4 = vpop.xlane.xlu0 %2294  ;;  %v3054_v47 = vsel %vm2333_vm8, %v3039_v58, %v3053_v9 }
 0x300   : > { %v3047_v22 = vrot.slane %v2295_v4, %v5894_v33 }
 0x301   : > { %v2244_v7 = vpop.xlane.xlu1 %2243 }
 0x302   : > { %v3048_v34 = vsel %vm2984_vm10, %v3047_v22, %v3043_v20  ;;  %v3210_v60 = vrot.slane %v2244_v7, %v5897_v62  ;;  %v3297_v62 = vld [vmem:[%s6016_s11 + $0x10] sm:$0xff] }
 0x303   : > { %v2247_v38 = vpop.xlane.xlu0 %2246  ;;  %v3055_v43 = vsel %vm2336_vm9, %v3048_v34, %v3054_v47 }
 0x304   : > { %v3214_v30 = vrot.slane %v2247_v38, %v5894_v33  ;;  %3963 = vmatmul.mubr.msk.f32.vlgmr.msra.gmra.mrb[48].mxu1 %vm2199_vm2, %v3055_v43  ;;  %v3298_v33 = vld [vmem:[%s6016_s11 + $0x18] sm:$0xff] }
 0x305   : > { %3988 = vmatpush3.bf16.msra.mxu1 %v3987_v61  ;;  %3969 = vmatprep.mubr.msk.f32.mxu1 %vm4050_vm0, %v6112_v45  ;;  %v3993_v27 = vpack.c.bf16 %v3298_v33, %v3297_v62 }
 0x306   : > { %v3215_v23 = vsel %vm2984_vm10, %v3214_v30, %v3210_v60  ;;  %3989 = vmatprep.subr.bf16.mxu1 %v4052_v37 }
 0x307   : > { %v3222_v54 = vsel %vm2336_vm9, %v3215_v23, %v3221_v1 }
 0x308   : > { %3970 = vmatmul.mubr.msk.f32.vlgmr.msra.gmra.mrb[50].mxu1 %vm2199_vm2, %v3222_v54 }
 0x309   : > { %3991 = vmatpush3.bf16.msra.mxu1 %v3990_v59  ;;  %3980 = vmatprep.mubr.msk.f32.mxu1 %vm4050_vm0, %v6112_v45 }
 0x30a   : > { %3992 = vmatprep.subr.bf16.mxu1 %v4052_v37 }
 0x30d   : > { %3994 = vmatpush3.bf16.msra.mxu1 %v3993_v27 }
 0x364   : > { %v2946_v19 = vpop.f32.mrb[48].mxu0 }
 0x365   : > { %v2947_v42 = vadd.f32 %v3486_v40, %v2946_v19  ;;  %v3956_v0 = vpop.f32.mrb[49].mxu0 }
 0x366   : > { %v2949_v10 = vpop.f32.mrb[50].mxu0 }
 0x367   : > { %v2952_v6 = vmax.f32 %v2947_v42, 0.0  ;;  %v3957_v12 = vpop.f32.mrb[51].mxu0 }
 0x369   : > { %3981 = vmatmul.mubr.msk.f32.vlgmr.msra.gmra.mrb[52].mxu1 %vm3299_vm11, %v2952_v6 }
 0x3d7   : > { %v3124_v63 = vpop.f32.mrb[48].mxu1 }
 0x3d8   : > { %v3964_v55 = vpop.f32.mrb[49].mxu1 }
 0x3db   : > { %v3291_v45 = vpop.f32.mrb[50].mxu1 }
 0x3dc   : > { %v3292_v39 = vadd.f32 %v3291_v45, %v3124_v63  ;;  %v3971_v37 = vpop.f32.mrb[51].mxu1 }
 0x43c   : > { %v3369_v8 = vpop.f32.mrb[52].mxu1 }
 0x43d   : > { %v3373_v51 = vadd.f32 %v3369_v8, %v3292_v39  ;;  %v3982_v35 = vpop.f32.mrb[53].mxu1 }
 0x43f   : > { %v3381_v57 = vadd.f32 %v3495_v14, %v3373_v51 }
 0x441   : > { %3383 = vst.msk [vmem:[%s442_s29] sm:$0xff] %vm3382_vm12, %v3381_v57 }
 0x442 PF: > { %s25_s27 = sadd.s32 1, %s4046_s27  }
 0x443   : > { %p22_p5 = scmp.ge.s32.totalorder %s25_s27, 6  }
 0x445   :  { %24 = sbr.rel (!%p22_p5) target bundleno = 3 (0x3), region = 109 }

</bundles_post_ra>
